<compile_context>
chip_gen: v7x
topology: tpu7x:2x2x1
jax: 0.10.0
libtpu: 0.0.40
codegen_flags: <defaults>
</compile_context>

<pallas_src>
import functools

import jax
import jax.numpy as jnp
from jax.experimental import pallas as pl
from jax.experimental.pallas import tpu as pltpu


def _round_up(n, m):
    return ((n + m - 1) // m) * m


def _pad_gate_axis(arr, H, Hp):
    """Pad the leading 4*H gate axis to 4*Hp, padding each i/f/g/o block."""
    a = arr.reshape((4, H) + arr.shape[1:])
    pad = [(0, 0)] * a.ndim
    pad[1] = (0, Hp - H)
    a = jnp.pad(a, pad)
    return a.reshape((4 * Hp,) + arr.shape[1:])


def _sigmoid(x):
    # sigmoid(x) == 0.5 * (tanh(x/2) + 1): a single EUP transcendental plus
    # cheap VPU ops, instead of the exp + divide jax.nn.sigmoid may lower to.
    return 0.5 * (jnp.tanh(0.5 * x) + 1.0)


def _lstm_kernel(pg_ref, whh_ref, h_ref, c_scr, *, unroll):
    """One grid step = `block_t` timesteps of the recurrence for one batch block.

    grid = (num_batch_blocks ["parallel"], T_pad // block_t ["arbitrary"])

    pg_ref : (block_t, Bb, 4*Hp)  pre-gates (x @ W_ih^T + b, precomputed in XLA)
    whh_ref: (Hp, 4*Hp)           W_hh^T, single-buffered, VMEM-resident
    h_ref  : (Bb, Hp)             output block; doubles as the h-state carry
    c_scr  : (Bb, Hp)             VMEM scratch; c-state carry
    """
    t = pl.program_id(1)
    Hp = whh_ref.shape[0]
    block_t = pg_ref.shape[0]
    w_dtype = whh_ref.dtype

    @pl.when(t == 0)
    def _init():
        h_ref[...] = jnp.zeros_like(h_ref)
        c_scr[...] = jnp.zeros_like(c_scr)

    def step(k, carry):
        h, c = carry
        hm = h.astype(w_dtype)
        pg = pg_ref[k]                                   # (Bb, 4Hp)

        # Four per-gate (Bb,Hp)@(Hp,Hp) matmuls instead of one (Bb,Hp)@(Hp,4Hp):
        # the i-gate sigmoid can start on the EUP while the MXU is still
        # producing f/g/o. All slices are 128-lane aligned (Hp % 128 == 0).
        def gate(g):
            z = jnp.dot(hm, whh_ref[:, g * Hp:(g + 1) * Hp],
                        preferred_element_type=jnp.float32)
            return z + pg[:, g * Hp:(g + 1) * Hp].astype(jnp.float32)

        # PyTorch gate order: i, f, g, o.
        i_g = _sigmoid(gate(0))
        f_g = _sigmoid(gate(1))
        g_g = jnp.tanh(gate(2))
        o_g = _sigmoid(gate(3))
        c_new = f_g * c + i_g * g_g
        h_new = o_g * jnp.tanh(c_new)
        return h_new, c_new

    h, c = jax.lax.fori_loop(0, block_t, step,
                             (h_ref[...], c_scr[...]), unroll=unroll)
    h_ref[...] = h
    c_scr[...] = c
    # Output block index is constant over t -> h_ref stays VMEM-resident and is
    # written back to HBM once per batch block (= h_last for that block).


def _vmem_budget_bytes():
    """Per-core VMEM capacity with ~25% headroom for Mosaic internal scratch."""
    try:
        cap = int(pltpu.get_tpu_info().vmem_capacity_bytes)
    except Exception:
        cap = 64 * 2 ** 20        # conservative (v7x-sized) fallback
    return cap * 3 // 4           # v7x: ~48 MiB, v5e/v6e: ~96 MiB


def _auto_num_batch_blocks(Bp):
    """Use both TensorCores on v7x (2 TC/chip) when the batch permits."""
    if Bp < 16:
        return 1
    try:
        kind = jax.devices()[0].device_kind.lower()
    except Exception:
        return 1
    # On single-TC generations (v5e/v6e) an extra grid axis is pure loop overhead.
    return 2 if ("v7" in kind or "7x" in kind) else 1


def simple_lstm_pallas(x, params, *, block_t=None, num_batch_blocks=None,
                       matmul_dtype=jnp.float32):
    """x: (B, T, input_size) float32, batch_first like PyTorch.

    block_t:          timesteps per grid step (None = auto-size to VMEM budget).
    num_batch_blocks: leading "parallel" grid axis (None = auto; 2 on v7x when
                      batch >= 16 so each TensorCore runs a half-batch recurrence).
    matmul_dtype:     dtype of recurrent-matmul operands and pre-gates. bf16 gives
                      ~3-4x MXU throughput and halves W_hh VMEM + pre-gate HBM
                      traffic, at ~1e-3 parity instead of 1e-5 (f32 default).
    """
    B, T, I = x.shape
    H = params["w_hh"].shape[1]
    f32 = jnp.float32

    nb = (_auto_num_batch_blocks(_round_up(B, 8)) if num_batch_blocks is None
          else max(1, int(num_batch_blocks)))

    # vreg-aligned padded sizes (f32 vreg: 8 sublanes x 128 lanes); batch is
    # additionally padded so it splits evenly across the batch grid axis.
    Bp = _round_up(B, 8 * nb)
    Bb = Bp // nb
    Hp = _round_up(H, 128)

    pg_dsize = jnp.dtype(matmul_dtype).itemsize
    w_dsize = jnp.dtype(matmul_dtype).itemsize

    # --- adaptive block_t from the per-generation VMEM budget ---------------
    budget = _vmem_budget_bytes()
    whh_bytes = Hp * 4 * Hp * w_dsize            # single-buffered (Buffered(1))
    state_bytes = 4 * Bb * Hp * 4                # h out block (x2) + c scratch
    per_t_bytes = 2 * Bb * 4 * Hp * pg_dsize     # double-buffered pre-gate slab
    bt_max = max(1, (budget - whh_bytes - state_bytes) // per_t_bytes)
    if block_t is None:
        block_t = int(min(32, bt_max, max(T, 1)))
    else:
        block_t = max(1, int(min(block_t, bt_max)))
    T_pad = _round_up(T, block_t)

    # Spill guard: with large live h/c loop-carries, cap the unroll factor so
    # the 64-vreg file isn't blown by the fully-unrolled region.
    state_vregs = max(1, (Bb * Hp) // 1024)      # f32 vregs per state array
    unroll = block_t if state_vregs <= 8 else min(block_t, 4)

    # --- hoisted input projection: ONE big XLA matmul over all timesteps ----
    w_ih_p = _pad_gate_axis(params["w_ih"].astype(f32), H, Hp)            # (4Hp, I)
    b_p = _pad_gate_axis((params["b_ih"] + params["b_hh"]).astype(f32), H, Hp)
    # Transpose fused into the einsum: emits the (T, B, 4Hp) layout directly.
    pre_gates = jnp.einsum("bti,gi->tbg", x.astype(f32), w_ih_p,
                           preferred_element_type=f32) + b_p
    # Zero pre-gates keep (h, c) exactly at 0 (i=f=o=0.5, g=0 => c=h=0), so
    # front-padding time is exact; padded batch rows are sliced off below.
    pre_gates = jnp.pad(pre_gates,
                        ((T_pad - T, 0), (0, Bp - B), (0, 0)))            # (T_pad, Bp, 4Hp)
    pre_gates = pre_gates.astype(matmul_dtype)

    # --- recurrent weight, per-gate padded, transposed for h @ W_hh^T -------
    w_hh_p = _pad_gate_axis(params["w_hh"].astype(f32), H, Hp)            # (4Hp, H)
    w_hh_p = jnp.pad(w_hh_p, ((0, 0), (0, Hp - H)))                       # (4Hp, Hp)
    whh_t = w_hh_p.T.astype(matmul_dtype)                                 # (Hp, 4Hp)

    usage = per_t_bytes * block_t + whh_bytes + state_bytes
    vmem_limit = int(min(budget, max(32 * 2 ** 20, usage * 5 // 4)))

    h_last_p = pl.pallas_call(
        functools.partial(_lstm_kernel, unroll=unroll),
        out_shape=jax.ShapeDtypeStruct((Bp, Hp), f32),
        grid_spec=pltpu.PrefetchScalarGridSpec(
            num_scalar_prefetch=0,
            grid=(nb, T_pad // block_t),
            in_specs=[
                # (block_t, Bb, 4Hp) pre-gate chunk per grid step
                pl.BlockSpec((block_t, Bb, 4 * Hp), lambda b, t: (t, b, 0)),
                # W_hh^T: constant index map -> single buffer, fetched once.
                pl.BlockSpec((Hp, 4 * Hp), lambda b, t: (0, 0),
                             pipeline_mode=pl.Buffered(buffer_count=1)),
            ],
            out_specs=pl.BlockSpec((Bb, Hp), lambda b, t: (b, 0)),
            scratch_shapes=[
                pltpu.VMEM((Bb, Hp), jnp.float32),   # c state
            ],
        ),
        compiler_params=pltpu.CompilerParams(
            # batch axis: independent recurrences (2 TCs on v7x);
            # time axis: serial recurrence.
            dimension_semantics=("parallel", "arbitrary"),
            vmem_limit_bytes=vmem_limit,
        ),
    )(pre_gates, whh_t)

    # --- final FC outside the recurrent kernel (plain XLA matmul) -----------
    h_last = h_last_p[:B, :H]
    return h_last @ params["w_fc"].T + params["b_fc"]


def init_params(key, input_size, hidden_size, output_size):
    # PyTorch default: uniform(-1/sqrt(H), 1/sqrt(H)) for LSTM and Linear params.
    k = 1.0 / jnp.sqrt(jnp.float32(hidden_size))
    ks = jax.random.split(key, 6)
    u = lambda kk, shape: jax.random.uniform(kk, shape, jnp.float32, -k, k)
    return {
        "w_ih": u(ks[0], (4 * hidden_size, input_size)),
        "w_hh": u(ks[1], (4 * hidden_size, hidden_size)),
        "b_ih": u(ks[2], (4 * hidden_size,)),
        "b_hh": u(ks[3], (4 * hidden_size,)),
        "w_fc": u(ks[4], (output_size, hidden_size)),
        "b_fc": u(ks[5], (output_size,)),
    }


def simple_lstm_ref(x, params):
    """Pure-JAX reference matching torch.nn.LSTM + Linear semantics."""
    B, T, I = x.shape
    H = params["w_hh"].shape[1]
    wih_t = params["w_ih"].T
    whh_t = params["w_hh"].T
    b = params["b_ih"] + params["b_hh"]

    def step(carry, x_t):
        h, c = carry
        gates = x_t @ wih_t + h @ whh_t + b
        i_g = jax.nn.sigmoid(gates[:, 0:H])
        f_g = jax.nn.sigmoid(gates[:, H:2 * H])
        g_g = jnp.tanh(gates[:, 2 * H:3 * H])
        o_g = jax.nn.sigmoid(gates[:, 3 * H:4 * H])
        c_new = f_g * c + i_g * g_g
        h_new = o_g * jnp.tanh(c_new)
        return (h_new, c_new), None

    h0 = jnp.zeros((B, H), jnp.float32)
    c0 = jnp.zeros((B, H), jnp.float32)
    (h_last, _), _ = jax.lax.scan(step, (h0, c0), jnp.transpose(x, (1, 0, 2)))
    return h_last @ params["w_fc"].T + params["b_fc"]


if __name__ == "__main__":
    B, T, INPUT, HIDDEN, OUTPUT = 2, 8, 16, 32, 4

    key = jax.random.PRNGKey(0)
    kx, kp = jax.random.split(key)
    x = jax.random.normal(kx, (B, T, INPUT), jnp.float32)
    params = init_params(kp, INPUT, HIDDEN, OUTPUT)

    ref = simple_lstm_ref(x, params)

    # f32 path: 1e-5 parity. block_t=None -> auto-sized; 8: whole sequence in
    # one grid step; 4: state carried across grid steps; 5: exercises the
    # front time-padding path (T_pad = 10).
    for bt in (None, 8, 4, 5):
        out = jax.block_until_ready(simple_lstm_pallas(x, params, block_t=bt))
        assert out.shape == (B, OUTPUT)
        assert jnp.allclose(out, ref, atol=1e-5, rtol=1e-5), bt

    # bf16 recurrent-matmul / pre-gate path (looser ~1e-3-level parity).
    out_bf16 = jax.block_until_ready(
        simple_lstm_pallas(x, params, block_t=8, matmul_dtype=jnp.bfloat16))
    assert out_bf16.shape == (B, OUTPUT)
    assert jnp.allclose(out_bf16, ref, atol=5e-2, rtol=5e-2)

    # Batch-parallel grid path (what v7x auto-selects when batch >= 16).
    B2 = 16
    x2 = jax.random.normal(jax.random.PRNGKey(1), (B2, T, INPUT), jnp.float32)
    ref2 = simple_lstm_ref(x2, params)
    out2 = jax.block_until_ready(
        simple_lstm_pallas(x2, params, block_t=4, num_batch_blocks=2))
    assert out2.shape == (B2, OUTPUT)
    assert jnp.allclose(out2, ref2, atol=1e-5, rtol=1e-5)

    print("KERNEL_OK")
</pallas_src>

<mosaic_0001>
module attributes {stable_mosaic.version = 11 : i64} {
  func.func @_lstm_kernel(%arg0: i32, %arg1: i32, %arg2: memref<8x8x512xf32, #tpu.memory_space<vmem>>, %arg3: memref<128x512xf32, #tpu.memory_space<vmem>>, %arg4: memref<8x128xf32, #tpu.memory_space<vmem>>, %arg5: memref<8x128xf32, #tpu.memory_space<vmem>>) attributes {dimension_semantics = [#tpu.dimension_semantics<parallel>, #tpu.dimension_semantics<arbitrary>], iteration_bounds = array<i64: 1, 1>, scalar_prefetch = 0 : i64, scratch_operands = 1 : i64, tpu.core_type = #tpu.core_type<tc>, window_params = [{transform_indices = @transform_0, window_bounds = array<i64: 8, 8, 512>}, {pipeline_mode = #tpu.pipeline_mode<synchronous>, transform_indices = @transform_1, window_bounds = array<i64: 128, 512>}, {transform_indices = @transform_2, window_bounds = array<i64: 8, 128>}]} {
    %c0_i32 = arith.constant 0 : i32
    %0 = arith.cmpi eq, %arg1, %c0_i32 : i32
    %1 = arith.extui %0 : i1 to i32
    %c0_i32_0 = arith.constant 0 : i32
    %2 = arith.cmpi ne, %1, %c0_i32_0 : i32
    scf.if %2 {
      %cst_189 = arith.constant 0.000000e+00 : f32
      %375 = vector.broadcast %cst_189 : f32 to vector<8x128xf32>
      %c0_190 = arith.constant 0 : index
      %c0_191 = arith.constant 0 : index
      %376 = vector.load %arg4[%c0_190, %c0_191] : memref<8x128xf32, #tpu.memory_space<vmem>>, vector<8x128xf32>
      tpu.vector_store %arg4[%c0_190, %c0_191], %375 {strides = array<i32>} : memref<8x128xf32, #tpu.memory_space<vmem>>, vector<8x128xf32>,
      %cst_192 = arith.constant 0.000000e+00 : f32
      %377 = vector.broadcast %cst_192 : f32 to vector<8x128xf32>
      %c0_193 = arith.constant 0 : index
      %c0_194 = arith.constant 0 : index
      %378 = vector.load %arg5[%c0_193, %c0_194] : memref<8x128xf32, #tpu.memory_space<vmem>>, vector<8x128xf32>
      tpu.vector_store %arg5[%c0_193, %c0_194], %377 {strides = array<i32>} : memref<8x128xf32, #tpu.memory_space<vmem>>, vector<8x128xf32>,
    } else {
    }
    %c0 = arith.constant 0 : index
    %c0_1 = arith.constant 0 : index
    %3 = vector.load %arg4[%c0, %c0_1] : memref<8x128xf32, #tpu.memory_space<vmem>>, vector<8x128xf32>
    %c0_2 = arith.constant 0 : index
    %c0_3 = arith.constant 0 : index
    %4 = vector.load %arg5[%c0_2, %c0_3] : memref<8x128xf32, #tpu.memory_space<vmem>>, vector<8x128xf32>
    %c0_i32_4 = arith.constant 0 : i32
    %5 = arith.index_cast %c0_i32_4 : i32 to index
    %c0_5 = arith.constant 0 : index
    %c0_6 = arith.constant 0 : index
    %6 = vector.load %arg2[%5, %c0_5, %c0_6] : memref<8x8x512xf32, #tpu.memory_space<vmem>>, vector<1x8x512xf32>
    %7 = vector.shape_cast %6 : vector<1x8x512xf32> to vector<8x512xf32>
    %c0_7 = arith.constant 0 : index
    %c0_8 = arith.constant 0 : index
    %8 = vector.load %arg3[%c0_7, %c0_8] : memref<128x512xf32, #tpu.memory_space<vmem>>, vector<128x128xf32>
    %cst = arith.constant dense<0.000000e+00> : vector<8x128xf32>
    %9 = tpu.matmul %3, %8, %cst {dimension_numbers = #tpu.dot_dimension_numbers<[1], [0], [0], [1], [0, 0, 1, 1], [], []>} : vector<8x128xf32>, vector<128x128xf32>, vector<8x128xf32> -> vector<8x128xf32>
    %10 = vector.extract_strided_slice %7 {offsets = [0, 0], sizes = [8, 128], strides = [1, 1]} : vector<8x512xf32> to vector<8x128xf32>
    %11 = arith.addf %9, %10 : vector<8x128xf32>
    %cst_9 = arith.constant 5.000000e-01 : f32
    %12 = vector.broadcast %cst_9 : f32 to vector<8x128xf32>
    %13 = arith.mulf %12, %11 : vector<8x128xf32>
    %14 = math.tanh %13 : vector<8x128xf32>
    %cst_10 = arith.constant 1.000000e+00 : f32
    %15 = vector.broadcast %cst_10 : f32 to vector<8x128xf32>
    %16 = arith.addf %14, %15 : vector<8x128xf32>
    %cst_11 = arith.constant 5.000000e-01 : f32
    %17 = vector.broadcast %cst_11 : f32 to vector<8x128xf32>
    %18 = arith.mulf %17, %16 : vector<8x128xf32>
    %c0_12 = arith.constant 0 : index
    %c128 = arith.constant 128 : index
    %19 = vector.load %arg3[%c0_12, %c128] : memref<128x512xf32, #tpu.memory_space<vmem>>, vector<128x128xf32>
    %cst_13 = arith.constant dense<0.000000e+00> : vector<8x128xf32>
    %20 = tpu.matmul %3, %19, %cst_13 {dimension_numbers = #tpu.dot_dimension_numbers<[1], [0], [0], [1], [0, 0, 1, 1], [], []>} : vector<8x128xf32>, vector<128x128xf32>, vector<8x128xf32> -> vector<8x128xf32>
    %21 = vector.extract_strided_slice %7 {offsets = [0, 128], sizes = [8, 128], strides = [1, 1]} : vector<8x512xf32> to vector<8x128xf32>
    %22 = arith.addf %20, %21 : vector<8x128xf32>
    %cst_14 = arith.constant 5.000000e-01 : f32
    %23 = vector.broadcast %cst_14 : f32 to vector<8x128xf32>
    %24 = arith.mulf %23, %22 : vector<8x128xf32>
    %25 = math.tanh %24 : vector<8x128xf32>
    %cst_15 = arith.constant 1.000000e+00 : f32
    %26 = vector.broadcast %cst_15 : f32 to vector<8x128xf32>
    %27 = arith.addf %25, %26 : vector<8x128xf32>
    %cst_16 = arith.constant 5.000000e-01 : f32
    %28 = vector.broadcast %cst_16 : f32 to vector<8x128xf32>
    %29 = arith.mulf %28, %27 : vector<8x128xf32>
    %c0_17 = arith.constant 0 : index
    %c256 = arith.constant 256 : index
    %30 = vector.load %arg3[%c0_17, %c256] : memref<128x512xf32, #tpu.memory_space<vmem>>, vector<128x128xf32>
    %cst_18 = arith.constant dense<0.000000e+00> : vector<8x128xf32>
    %31 = tpu.matmul %3, %30, %cst_18 {dimension_numbers = #tpu.dot_dimension_numbers<[1], [0], [0], [1], [0, 0, 1, 1], [], []>} : vector<8x128xf32>, vector<128x128xf32>, vector<8x128xf32> -> vector<8x128xf32>
    %32 = vector.extract_strided_slice %7 {offsets = [0, 256], sizes = [8, 128], strides = [1, 1]} : vector<8x512xf32> to vector<8x128xf32>
    %33 = arith.addf %31, %32 : vector<8x128xf32>
    %34 = math.tanh %33 : vector<8x128xf32>
    %c0_19 = arith.constant 0 : index
    %c384 = arith.constant 384 : index
    %35 = vector.load %arg3[%c0_19, %c384] : memref<128x512xf32, #tpu.memory_space<vmem>>, vector<128x128xf32>
    %cst_20 = arith.constant dense<0.000000e+00> : vector<8x128xf32>
    %36 = tpu.matmul %3, %35, %cst_20 {dimension_numbers = #tpu.dot_dimension_numbers<[1], [0], [0], [1], [0, 0, 1, 1], [], []>} : vector<8x128xf32>, vector<128x128xf32>, vector<8x128xf32> -> vector<8x128xf32>
    %37 = vector.extract_strided_slice %7 {offsets = [0, 384], sizes = [8, 128], strides = [1, 1]} : vector<8x512xf32> to vector<8x128xf32>
    %38 = arith.addf %36, %37 : vector<8x128xf32>
    %cst_21 = arith.constant 5.000000e-01 : f32
    %39 = vector.broadcast %cst_21 : f32 to vector<8x128xf32>
    %40 = arith.mulf %39, %38 : vector<8x128xf32>
    %41 = math.tanh %40 : vector<8x128xf32>
    %cst_22 = arith.constant 1.000000e+00 : f32
    %42 = vector.broadcast %cst_22 : f32 to vector<8x128xf32>
    %43 = arith.addf %41, %42 : vector<8x128xf32>
    %cst_23 = arith.constant 5.000000e-01 : f32
    %44 = vector.broadcast %cst_23 : f32 to vector<8x128xf32>
    %45 = arith.mulf %44, %43 : vector<8x128xf32>
    %46 = arith.mulf %29, %4 : vector<8x128xf32>
    %47 = arith.mulf %18, %34 : vector<8x128xf32>
    %48 = arith.addf %46, %47 : vector<8x128xf32>
    %49 = math.tanh %48 : vector<8x128xf32>
    %50 = arith.mulf %45, %49 : vector<8x128xf32>
    %c1_i32 = arith.constant 1 : i32
    %51 = arith.index_cast %c1_i32 : i32 to index
    %c0_24 = arith.constant 0 : index
    %c0_25 = arith.constant 0 : index
    %52 = vector.load %arg2[%51, %c0_24, %c0_25] : memref<8x8x512xf32, #tpu.memory_space<vmem>>, vector<1x8x512xf32>
    %53 = vector.shape_cast %52 : vector<1x8x512xf32> to vector<8x512xf32>
    %c0_26 = arith.constant 0 : index
    %c0_27 = arith.constant 0 : index
    %54 = vector.load %arg3[%c0_26, %c0_27] : memref<128x512xf32, #tpu.memory_space<vmem>>, vector<128x128xf32>
    %cst_28 = arith.constant dense<0.000000e+00> : vector<8x128xf32>
    %55 = tpu.matmul %50, %54, %cst_28 {dimension_numbers = #tpu.dot_dimension_numbers<[1], [0], [0], [1], [0, 0, 1, 1], [], []>} : vector<8x128xf32>, vector<128x128xf32>, vector<8x128xf32> -> vector<8x128xf32>
    %56 = vector.extract_strided_slice %53 {offsets = [0, 0], sizes = [8, 128], strides = [1, 1]} : vector<8x512xf32> to vector<8x128xf32>
    %57 = arith.addf %55, %56 : vector<8x128xf32>
    %cst_29 = arith.constant 5.000000e-01 : f32
    %58 = vector.broadcast %cst_29 : f32 to vector<8x128xf32>
    %59 = arith.mulf %58, %57 : vector<8x128xf32>
    %60 = math.tanh %59 : vector<8x128xf32>
    %cst_30 = arith.constant 1.000000e+00 : f32
    %61 = vector.broadcast %cst_30 : f32 to vector<8x128xf32>
    %62 = arith.addf %60, %61 : vector<8x128xf32>
    %cst_31 = arith.constant 5.000000e-01 : f32
    %63 = vector.broadcast %cst_31 : f32 to vector<8x128xf32>
    %64 = arith.mulf %63, %62 : vector<8x128xf32>
    %c0_32 = arith.constant 0 : index
    %c128_33 = arith.constant 128 : index
    %65 = vector.load %arg3[%c0_32, %c128_33] : memref<128x512xf32, #tpu.memory_space<vmem>>, vector<128x128xf32>
    %cst_34 = arith.constant dense<0.000000e+00> : vector<8x128xf32>
    %66 = tpu.matmul %50, %65, %cst_34 {dimension_numbers = #tpu.dot_dimension_numbers<[1], [0], [0], [1], [0, 0, 1, 1], [], []>} : vector<8x128xf32>, vector<128x128xf32>, vector<8x128xf32> -> vector<8x128xf32>
    %67 = vector.extract_strided_slice %53 {offsets = [0, 128], sizes = [8, 128], strides = [1, 1]} : vector<8x512xf32> to vector<8x128xf32>
    %68 = arith.addf %66, %67 : vector<8x128xf32>
    %cst_35 = arith.constant 5.000000e-01 : f32
    %69 = vector.broadcast %cst_35 : f32 to vector<8x128xf32>
    %70 = arith.mulf %69, %68 : vector<8x128xf32>
    %71 = math.tanh %70 : vector<8x128xf32>
    %cst_36 = arith.constant 1.000000e+00 : f32
    %72 = vector.broadcast %cst_36 : f32 to vector<8x128xf32>
    %73 = arith.addf %71, %72 : vector<8x128xf32>
    %cst_37 = arith.constant 5.000000e-01 : f32
    %74 = vector.broadcast %cst_37 : f32 to vector<8x128xf32>
    %75 = arith.mulf %74, %73 : vector<8x128xf32>
    %c0_38 = arith.constant 0 : index
    %c256_39 = arith.constant 256 : index
    %76 = vector.load %arg3[%c0_38, %c256_39] : memref<128x512xf32, #tpu.memory_space<vmem>>, vector<128x128xf32>
    %cst_40 = arith.constant dense<0.000000e+00> : vector<8x128xf32>
    %77 = tpu.matmul %50, %76, %cst_40 {dimension_numbers = #tpu.dot_dimension_numbers<[1], [0], [0], [1], [0, 0, 1, 1], [], []>} : vector<8x128xf32>, vector<128x128xf32>, vector<8x128xf32> -> vector<8x128xf32>
    %78 = vector.extract_strided_slice %53 {offsets = [0, 256], sizes = [8, 128], strides = [1, 1]} : vector<8x512xf32> to vector<8x128xf32>
    %79 = arith.addf %77, %78 : vector<8x128xf32>
    %80 = math.tanh %79 : vector<8x128xf32>
    %c0_41 = arith.constant 0 : index
    %c384_42 = arith.constant 384 : index
    %81 = vector.load %arg3[%c0_41, %c384_42] : memref<128x512xf32, #tpu.memory_space<vmem>>, vector<128x128xf32>
    %cst_43 = arith.constant dense<0.000000e+00> : vector<8x128xf32>
    %82 = tpu.matmul %50, %81, %cst_43 {dimension_numbers = #tpu.dot_dimension_numbers<[1], [0], [0], [1], [0, 0, 1, 1], [], []>} : vector<8x128xf32>, vector<128x128xf32>, vector<8x128xf32> -> vector<8x128xf32>
    %83 = vector.extract_strided_slice %53 {offsets = [0, 384], sizes = [8, 128], strides = [1, 1]} : vector<8x512xf32> to vector<8x128xf32>
    %84 = arith.addf %82, %83 : vector<8x128xf32>
    %cst_44 = arith.constant 5.000000e-01 : f32
    %85 = vector.broadcast %cst_44 : f32 to vector<8x128xf32>
    %86 = arith.mulf %85, %84 : vector<8x128xf32>
    %87 = math.tanh %86 : vector<8x128xf32>
    %cst_45 = arith.constant 1.000000e+00 : f32
    %88 = vector.broadcast %cst_45 : f32 to vector<8x128xf32>
    %89 = arith.addf %87, %88 : vector<8x128xf32>
    %cst_46 = arith.constant 5.000000e-01 : f32
    %90 = vector.broadcast %cst_46 : f32 to vector<8x128xf32>
    %91 = arith.mulf %90, %89 : vector<8x128xf32>
    %92 = arith.mulf %75, %48 : vector<8x128xf32>
    %93 = arith.mulf %64, %80 : vector<8x128xf32>
    %94 = arith.addf %92, %93 : vector<8x128xf32>
    %95 = math.tanh %94 : vector<8x128xf32>
    %96 = arith.mulf %91, %95 : vector<8x128xf32>
    %c2_i32 = arith.constant 2 : i32
    %97 = arith.index_cast %c2_i32 : i32 to index
    %c0_47 = arith.constant 0 : index
    %c0_48 = arith.constant 0 : index
    %98 = vector.load %arg2[%97, %c0_47, %c0_48] : memref<8x8x512xf32, #tpu.memory_space<vmem>>, vector<1x8x512xf32>
    %99 = vector.shape_cast %98 : vector<1x8x512xf32> to vector<8x512xf32>
    %c0_49 = arith.constant 0 : index
    %c0_50 = arith.constant 0 : index
    %100 = vector.load %arg3[%c0_49, %c0_50] : memref<128x512xf32, #tpu.memory_space<vmem>>, vector<128x128xf32>
    %cst_51 = arith.constant dense<0.000000e+00> : vector<8x128xf32>
    %101 = tpu.matmul %96, %100, %cst_51 {dimension_numbers = #tpu.dot_dimension_numbers<[1], [0], [0], [1], [0, 0, 1, 1], [], []>} : vector<8x128xf32>, vector<128x128xf32>, vector<8x128xf32> -> vector<8x128xf32>
    %102 = vector.extract_strided_slice %99 {offsets = [0, 0], sizes = [8, 128], strides = [1, 1]} : vector<8x512xf32> to vector<8x128xf32>
    %103 = arith.addf %101, %102 : vector<8x128xf32>
    %cst_52 = arith.constant 5.000000e-01 : f32
    %104 = vector.broadcast %cst_52 : f32 to vector<8x128xf32>
    %105 = arith.mulf %104, %103 : vector<8x128xf32>
    %106 = math.tanh %105 : vector<8x128xf32>
    %cst_53 = arith.constant 1.000000e+00 : f32
    %107 = vector.broadcast %cst_53 : f32 to vector<8x128xf32>
    %108 = arith.addf %106, %107 : vector<8x128xf32>
    %cst_54 = arith.constant 5.000000e-01 : f32
    %109 = vector.broadcast %cst_54 : f32 to vector<8x128xf32>
    %110 = arith.mulf %109, %108 : vector<8x128xf32>
    %c0_55 = arith.constant 0 : index
    %c128_56 = arith.constant 128 : index
    %111 = vector.load %arg3[%c0_55, %c128_56] : memref<128x512xf32, #tpu.memory_space<vmem>>, vector<128x128xf32>
    %cst_57 = arith.constant dense<0.000000e+00> : vector<8x128xf32>
    %112 = tpu.matmul %96, %111, %cst_57 {dimension_numbers = #tpu.dot_dimension_numbers<[1], [0], [0], [1], [0, 0, 1, 1], [], []>} : vector<8x128xf32>, vector<128x128xf32>, vector<8x128xf32> -> vector<8x128xf32>
    %113 = vector.extract_strided_slice %99 {offsets = [0, 128], sizes = [8, 128], strides = [1, 1]} : vector<8x512xf32> to vector<8x128xf32>
    %114 = arith.addf %112, %113 : vector<8x128xf32>
    %cst_58 = arith.constant 5.000000e-01 : f32
    %115 = vector.broadcast %cst_58 : f32 to vector<8x128xf32>
    %116 = arith.mulf %115, %114 : vector<8x128xf32>
    %117 = math.tanh %116 : vector<8x128xf32>
    %cst_59 = arith.constant 1.000000e+00 : f32
    %118 = vector.broadcast %cst_59 : f32 to vector<8x128xf32>
    %119 = arith.addf %117, %118 : vector<8x128xf32>
    %cst_60 = arith.constant 5.000000e-01 : f32
    %120 = vector.broadcast %cst_60 : f32 to vector<8x128xf32>
    %121 = arith.mulf %120, %119 : vector<8x128xf32>
    %c0_61 = arith.constant 0 : index
    %c256_62 = arith.constant 256 : index
    %122 = vector.load %arg3[%c0_61, %c256_62] : memref<128x512xf32, #tpu.memory_space<vmem>>, vector<128x128xf32>
    %cst_63 = arith.constant dense<0.000000e+00> : vector<8x128xf32>
    %123 = tpu.matmul %96, %122, %cst_63 {dimension_numbers = #tpu.dot_dimension_numbers<[1], [0], [0], [1], [0, 0, 1, 1], [], []>} : vector<8x128xf32>, vector<128x128xf32>, vector<8x128xf32> -> vector<8x128xf32>
    %124 = vector.extract_strided_slice %99 {offsets = [0, 256], sizes = [8, 128], strides = [1, 1]} : vector<8x512xf32> to vector<8x128xf32>
    %125 = arith.addf %123, %124 : vector<8x128xf32>
    %126 = math.tanh %125 : vector<8x128xf32>
    %c0_64 = arith.constant 0 : index
    %c384_65 = arith.constant 384 : index
    %127 = vector.load %arg3[%c0_64, %c384_65] : memref<128x512xf32, #tpu.memory_space<vmem>>, vector<128x128xf32>
    %cst_66 = arith.constant dense<0.000000e+00> : vector<8x128xf32>
    %128 = tpu.matmul %96, %127, %cst_66 {dimension_numbers = #tpu.dot_dimension_numbers<[1], [0], [0], [1], [0, 0, 1, 1], [], []>} : vector<8x128xf32>, vector<128x128xf32>, vector<8x128xf32> -> vector<8x128xf32>
    %129 = vector.extract_strided_slice %99 {offsets = [0, 384], sizes = [8, 128], strides = [1, 1]} : vector<8x512xf32> to vector<8x128xf32>
    %130 = arith.addf %128, %129 : vector<8x128xf32>
    %cst_67 = arith.constant 5.000000e-01 : f32
    %131 = vector.broadcast %cst_67 : f32 to vector<8x128xf32>
    %132 = arith.mulf %131, %130 : vector<8x128xf32>
    %133 = math.tanh %132 : vector<8x128xf32>
    %cst_68 = arith.constant 1.000000e+00 : f32
    %134 = vector.broadcast %cst_68 : f32 to vector<8x128xf32>
    %135 = arith.addf %133, %134 : vector<8x128xf32>
    %cst_69 = arith.constant 5.000000e-01 : f32
    %136 = vector.broadcast %cst_69 : f32 to vector<8x128xf32>
    %137 = arith.mulf %136, %135 : vector<8x128xf32>
    %138 = arith.mulf %121, %94 : vector<8x128xf32>
    %139 = arith.mulf %110, %126 : vector<8x128xf32>
    %140 = arith.addf %138, %139 : vector<8x128xf32>
    %141 = math.tanh %140 : vector<8x128xf32>
    %142 = arith.mulf %137, %141 : vector<8x128xf32>
    %c3_i32 = arith.constant 3 : i32
    %143 = arith.index_cast %c3_i32 : i32 to index
    %c0_70 = arith.constant 0 : index
    %c0_71 = arith.constant 0 : index
    %144 = vector.load %arg2[%143, %c0_70, %c0_71] : memref<8x8x512xf32, #tpu.memory_space<vmem>>, vector<1x8x512xf32>
    %145 = vector.shape_cast %144 : vector<1x8x512xf32> to vector<8x512xf32>
    %c0_72 = arith.constant 0 : index
    %c0_73 = arith.constant 0 : index
    %146 = vector.load %arg3[%c0_72, %c0_73] : memref<128x512xf32, #tpu.memory_space<vmem>>, vector<128x128xf32>
    %cst_74 = arith.constant dense<0.000000e+00> : vector<8x128xf32>
    %147 = tpu.matmul %142, %146, %cst_74 {dimension_numbers = #tpu.dot_dimension_numbers<[1], [0], [0], [1], [0, 0, 1, 1], [], []>} : vector<8x128xf32>, vector<128x128xf32>, vector<8x128xf32> -> vector<8x128xf32>
    %148 = vector.extract_strided_slice %145 {offsets = [0, 0], sizes = [8, 128], strides = [1, 1]} : vector<8x512xf32> to vector<8x128xf32>
    %149 = arith.addf %147, %148 : vector<8x128xf32>
    %cst_75 = arith.constant 5.000000e-01 : f32
    %150 = vector.broadcast %cst_75 : f32 to vector<8x128xf32>
    %151 = arith.mulf %150, %149 : vector<8x128xf32>
    %152 = math.tanh %151 : vector<8x128xf32>
    %cst_76 = arith.constant 1.000000e+00 : f32
    %153 = vector.broadcast %cst_76 : f32 to vector<8x128xf32>
    %154 = arith.addf %152, %153 : vector<8x128xf32>
    %cst_77 = arith.constant 5.000000e-01 : f32
    %155 = vector.broadcast %cst_77 : f32 to vector<8x128xf32>
    %156 = arith.mulf %155, %154 : vector<8x128xf32>
    %c0_78 = arith.constant 0 : index
    %c128_79 = arith.constant 128 : index
    %157 = vector.load %arg3[%c0_78, %c128_79] : memref<128x512xf32, #tpu.memory_space<vmem>>, vector<128x128xf32>
    %cst_80 = arith.constant dense<0.000000e+00> : vector<8x128xf32>
    %158 = tpu.matmul %142, %157, %cst_80 {dimension_numbers = #tpu.dot_dimension_numbers<[1], [0], [0], [1], [0, 0, 1, 1], [], []>} : vector<8x128xf32>, vector<128x128xf32>, vector<8x128xf32> -> vector<8x128xf32>
    %159 = vector.extract_strided_slice %145 {offsets = [0, 128], sizes = [8, 128], strides = [1, 1]} : vector<8x512xf32> to vector<8x128xf32>
    %160 = arith.addf %158, %159 : vector<8x128xf32>
    %cst_81 = arith.constant 5.000000e-01 : f32
    %161 = vector.broadcast %cst_81 : f32 to vector<8x128xf32>
    %162 = arith.mulf %161, %160 : vector<8x128xf32>
    %163 = math.tanh %162 : vector<8x128xf32>
    %cst_82 = arith.constant 1.000000e+00 : f32
    %164 = vector.broadcast %cst_82 : f32 to vector<8x128xf32>
    %165 = arith.addf %163, %164 : vector<8x128xf32>
    %cst_83 = arith.constant 5.000000e-01 : f32
    %166 = vector.broadcast %cst_83 : f32 to vector<8x128xf32>
    %167 = arith.mulf %166, %165 : vector<8x128xf32>
    %c0_84 = arith.constant 0 : index
    %c256_85 = arith.constant 256 : index
    %168 = vector.load %arg3[%c0_84, %c256_85] : memref<128x512xf32, #tpu.memory_space<vmem>>, vector<128x128xf32>
    %cst_86 = arith.constant dense<0.000000e+00> : vector<8x128xf32>
    %169 = tpu.matmul %142, %168, %cst_86 {dimension_numbers = #tpu.dot_dimension_numbers<[1], [0], [0], [1], [0, 0, 1, 1], [], []>} : vector<8x128xf32>, vector<128x128xf32>, vector<8x128xf32> -> vector<8x128xf32>
    %170 = vector.extract_strided_slice %145 {offsets = [0, 256], sizes = [8, 128], strides = [1, 1]} : vector<8x512xf32> to vector<8x128xf32>
    %171 = arith.addf %169, %170 : vector<8x128xf32>
    %172 = math.tanh %171 : vector<8x128xf32>
    %c0_87 = arith.constant 0 : index
    %c384_88 = arith.constant 384 : index
    %173 = vector.load %arg3[%c0_87, %c384_88] : memref<128x512xf32, #tpu.memory_space<vmem>>, vector<128x128xf32>
    %cst_89 = arith.constant dense<0.000000e+00> : vector<8x128xf32>
    %174 = tpu.matmul %142, %173, %cst_89 {dimension_numbers = #tpu.dot_dimension_numbers<[1], [0], [0], [1], [0, 0, 1, 1], [], []>} : vector<8x128xf32>, vector<128x128xf32>, vector<8x128xf32> -> vector<8x128xf32>
    %175 = vector.extract_strided_slice %145 {offsets = [0, 384], sizes = [8, 128], strides = [1, 1]} : vector<8x512xf32> to vector<8x128xf32>
    %176 = arith.addf %174, %175 : vector<8x128xf32>
    %cst_90 = arith.constant 5.000000e-01 : f32
    %177 = vector.broadcast %cst_90 : f32 to vector<8x128xf32>
    %178 = arith.mulf %177, %176 : vector<8x128xf32>
    %179 = math.tanh %178 : vector<8x128xf32>
    %cst_91 = arith.constant 1.000000e+00 : f32
    %180 = vector.broadcast %cst_91 : f32 to vector<8x128xf32>
    %181 = arith.addf %179, %180 : vector<8x128xf32>
    %cst_92 = arith.constant 5.000000e-01 : f32
    %182 = vector.broadcast %cst_92 : f32 to vector<8x128xf32>
    %183 = arith.mulf %182, %181 : vector<8x128xf32>
    %184 = arith.mulf %167, %140 : vector<8x128xf32>
    %185 = arith.mulf %156, %172 : vector<8x128xf32>
    %186 = arith.addf %184, %185 : vector<8x128xf32>
    %187 = math.tanh %186 : vector<8x128xf32>
    %188 = arith.mulf %183, %187 : vector<8x128xf32>
    %c4_i32 = arith.constant 4 : i32
    %189 = arith.index_cast %c4_i32 : i32 to index
    %c0_93 = arith.constant 0 : index
    %c0_94 = arith.constant 0 : index
    %190 = vector.load %arg2[%189, %c0_93, %c0_94] : memref<8x8x512xf32, #tpu.memory_space<vmem>>, vector<1x8x512xf32>
    %191 = vector.shape_cast %190 : vector<1x8x512xf32> to vector<8x512xf32>
    %c0_95 = arith.constant 0 : index
    %c0_96 = arith.constant 0 : index
    %192 = vector.load %arg3[%c0_95, %c0_96] : memref<128x512xf32, #tpu.memory_space<vmem>>, vector<128x128xf32>
    %cst_97 = arith.constant dense<0.000000e+00> : vector<8x128xf32>
    %193 = tpu.matmul %188, %192, %cst_97 {dimension_numbers = #tpu.dot_dimension_numbers<[1], [0], [0], [1], [0, 0, 1, 1], [], []>} : vector<8x128xf32>, vector<128x128xf32>, vector<8x128xf32> -> vector<8x128xf32>
    %194 = vector.extract_strided_slice %191 {offsets = [0, 0], sizes = [8, 128], strides = [1, 1]} : vector<8x512xf32> to vector<8x128xf32>
    %195 = arith.addf %193, %194 : vector<8x128xf32>
    %cst_98 = arith.constant 5.000000e-01 : f32
    %196 = vector.broadcast %cst_98 : f32 to vector<8x128xf32>
    %197 = arith.mulf %196, %195 : vector<8x128xf32>
    %198 = math.tanh %197 : vector<8x128xf32>
    %cst_99 = arith.constant 1.000000e+00 : f32
    %199 = vector.broadcast %cst_99 : f32 to vector<8x128xf32>
    %200 = arith.addf %198, %199 : vector<8x128xf32>
    %cst_100 = arith.constant 5.000000e-01 : f32
    %201 = vector.broadcast %cst_100 : f32 to vector<8x128xf32>
    %202 = arith.mulf %201, %200 : vector<8x128xf32>
    %c0_101 = arith.constant 0 : index
    %c128_102 = arith.constant 128 : index
    %203 = vector.load %arg3[%c0_101, %c128_102] : memref<128x512xf32, #tpu.memory_space<vmem>>, vector<128x128xf32>
    %cst_103 = arith.constant dense<0.000000e+00> : vector<8x128xf32>
    %204 = tpu.matmul %188, %203, %cst_103 {dimension_numbers = #tpu.dot_dimension_numbers<[1], [0], [0], [1], [0, 0, 1, 1], [], []>} : vector<8x128xf32>, vector<128x128xf32>, vector<8x128xf32> -> vector<8x128xf32>
    %205 = vector.extract_strided_slice %191 {offsets = [0, 128], sizes = [8, 128], strides = [1, 1]} : vector<8x512xf32> to vector<8x128xf32>
    %206 = arith.addf %204, %205 : vector<8x128xf32>
    %cst_104 = arith.constant 5.000000e-01 : f32
    %207 = vector.broadcast %cst_104 : f32 to vector<8x128xf32>
    %208 = arith.mulf %207, %206 : vector<8x128xf32>
    %209 = math.tanh %208 : vector<8x128xf32>
    %cst_105 = arith.constant 1.000000e+00 : f32
    %210 = vector.broadcast %cst_105 : f32 to vector<8x128xf32>
    %211 = arith.addf %209, %210 : vector<8x128xf32>
    %cst_106 = arith.constant 5.000000e-01 : f32
    %212 = vector.broadcast %cst_106 : f32 to vector<8x128xf32>
    %213 = arith.mulf %212, %211 : vector<8x128xf32>
    %c0_107 = arith.constant 0 : index
    %c256_108 = arith.constant 256 : index
    %214 = vector.load %arg3[%c0_107, %c256_108] : memref<128x512xf32, #tpu.memory_space<vmem>>, vector<128x128xf32>
    %cst_109 = arith.constant dense<0.000000e+00> : vector<8x128xf32>
    %215 = tpu.matmul %188, %214, %cst_109 {dimension_numbers = #tpu.dot_dimension_numbers<[1], [0], [0], [1], [0, 0, 1, 1], [], []>} : vector<8x128xf32>, vector<128x128xf32>, vector<8x128xf32> -> vector<8x128xf32>
    %216 = vector.extract_strided_slice %191 {offsets = [0, 256], sizes = [8, 128], strides = [1, 1]} : vector<8x512xf32> to vector<8x128xf32>
    %217 = arith.addf %215, %216 : vector<8x128xf32>
    %218 = math.tanh %217 : vector<8x128xf32>
    %c0_110 = arith.constant 0 : index
    %c384_111 = arith.constant 384 : index
    %219 = vector.load %arg3[%c0_110, %c384_111] : memref<128x512xf32, #tpu.memory_space<vmem>>, vector<128x128xf32>
    %cst_112 = arith.constant dense<0.000000e+00> : vector<8x128xf32>
    %220 = tpu.matmul %188, %219, %cst_112 {dimension_numbers = #tpu.dot_dimension_numbers<[1], [0], [0], [1], [0, 0, 1, 1], [], []>} : vector<8x128xf32>, vector<128x128xf32>, vector<8x128xf32> -> vector<8x128xf32>
    %221 = vector.extract_strided_slice %191 {offsets = [0, 384], sizes = [8, 128], strides = [1, 1]} : vector<8x512xf32> to vector<8x128xf32>
    %222 = arith.addf %220, %221 : vector<8x128xf32>
    %cst_113 = arith.constant 5.000000e-01 : f32
    %223 = vector.broadcast %cst_113 : f32 to vector<8x128xf32>
    %224 = arith.mulf %223, %222 : vector<8x128xf32>
    %225 = math.tanh %224 : vector<8x128xf32>
    %cst_114 = arith.constant 1.000000e+00 : f32
    %226 = vector.broadcast %cst_114 : f32 to vector<8x128xf32>
    %227 = arith.addf %225, %226 : vector<8x128xf32>
    %cst_115 = arith.constant 5.000000e-01 : f32
    %228 = vector.broadcast %cst_115 : f32 to vector<8x128xf32>
    %229 = arith.mulf %228, %227 : vector<8x128xf32>
    %230 = arith.mulf %213, %186 : vector<8x128xf32>
    %231 = arith.mulf %202, %218 : vector<8x128xf32>
    %232 = arith.addf %230, %231 : vector<8x128xf32>
    %233 = math.tanh %232 : vector<8x128xf32>
    %234 = arith.mulf %229, %233 : vector<8x128xf32>
    %c5_i32 = arith.constant 5 : i32
    %235 = arith.index_cast %c5_i32 : i32 to index
    %c0_116 = arith.constant 0 : index
    %c0_117 = arith.constant 0 : index
    %236 = vector.load %arg2[%235, %c0_116, %c0_117] : memref<8x8x512xf32, #tpu.memory_space<vmem>>, vector<1x8x512xf32>
    %237 = vector.shape_cast %236 : vector<1x8x512xf32> to vector<8x512xf32>
    %c0_118 = arith.constant 0 : index
    %c0_119 = arith.constant 0 : index
    %238 = vector.load %arg3[%c0_118, %c0_119] : memref<128x512xf32, #tpu.memory_space<vmem>>, vector<128x128xf32>
    %cst_120 = arith.constant dense<0.000000e+00> : vector<8x128xf32>
    %239 = tpu.matmul %234, %238, %cst_120 {dimension_numbers = #tpu.dot_dimension_numbers<[1], [0], [0], [1], [0, 0, 1, 1], [], []>} : vector<8x128xf32>, vector<128x128xf32>, vector<8x128xf32> -> vector<8x128xf32>
    %240 = vector.extract_strided_slice %237 {offsets = [0, 0], sizes = [8, 128], strides = [1, 1]} : vector<8x512xf32> to vector<8x128xf32>
    %241 = arith.addf %239, %240 : vector<8x128xf32>
    %cst_121 = arith.constant 5.000000e-01 : f32
    %242 = vector.broadcast %cst_121 : f32 to vector<8x128xf32>
    %243 = arith.mulf %242, %241 : vector<8x128xf32>
    %244 = math.tanh %243 : vector<8x128xf32>
    %cst_122 = arith.constant 1.000000e+00 : f32
    %245 = vector.broadcast %cst_122 : f32 to vector<8x128xf32>
    %246 = arith.addf %244, %245 : vector<8x128xf32>
    %cst_123 = arith.constant 5.000000e-01 : f32
    %247 = vector.broadcast %cst_123 : f32 to vector<8x128xf32>
    %248 = arith.mulf %247, %246 : vector<8x128xf32>
    %c0_124 = arith.constant 0 : index
    %c128_125 = arith.constant 128 : index
    %249 = vector.load %arg3[%c0_124, %c128_125] : memref<128x512xf32, #tpu.memory_space<vmem>>, vector<128x128xf32>
    %cst_126 = arith.constant dense<0.000000e+00> : vector<8x128xf32>
    %250 = tpu.matmul %234, %249, %cst_126 {dimension_numbers = #tpu.dot_dimension_numbers<[1], [0], [0], [1], [0, 0, 1, 1], [], []>} : vector<8x128xf32>, vector<128x128xf32>, vector<8x128xf32> -> vector<8x128xf32>
    %251 = vector.extract_strided_slice %237 {offsets = [0, 128], sizes = [8, 128], strides = [1, 1]} : vector<8x512xf32> to vector<8x128xf32>
    %252 = arith.addf %250, %251 : vector<8x128xf32>
    %cst_127 = arith.constant 5.000000e-01 : f32
    %253 = vector.broadcast %cst_127 : f32 to vector<8x128xf32>
    %254 = arith.mulf %253, %252 : vector<8x128xf32>
    %255 = math.tanh %254 : vector<8x128xf32>
    %cst_128 = arith.constant 1.000000e+00 : f32
    %256 = vector.broadcast %cst_128 : f32 to vector<8x128xf32>
    %257 = arith.addf %255, %256 : vector<8x128xf32>
    %cst_129 = arith.constant 5.000000e-01 : f32
    %258 = vector.broadcast %cst_129 : f32 to vector<8x128xf32>
    %259 = arith.mulf %258, %257 : vector<8x128xf32>
    %c0_130 = arith.constant 0 : index
    %c256_131 = arith.constant 256 : index
    %260 = vector.load %arg3[%c0_130, %c256_131] : memref<128x512xf32, #tpu.memory_space<vmem>>, vector<128x128xf32>
    %cst_132 = arith.constant dense<0.000000e+00> : vector<8x128xf32>
    %261 = tpu.matmul %234, %260, %cst_132 {dimension_numbers = #tpu.dot_dimension_numbers<[1], [0], [0], [1], [0, 0, 1, 1], [], []>} : vector<8x128xf32>, vector<128x128xf32>, vector<8x128xf32> -> vector<8x128xf32>
    %262 = vector.extract_strided_slice %237 {offsets = [0, 256], sizes = [8, 128], strides = [1, 1]} : vector<8x512xf32> to vector<8x128xf32>
    %263 = arith.addf %261, %262 : vector<8x128xf32>
    %264 = math.tanh %263 : vector<8x128xf32>
    %c0_133 = arith.constant 0 : index
    %c384_134 = arith.constant 384 : index
    %265 = vector.load %arg3[%c0_133, %c384_134] : memref<128x512xf32, #tpu.memory_space<vmem>>, vector<128x128xf32>
    %cst_135 = arith.constant dense<0.000000e+00> : vector<8x128xf32>
    %266 = tpu.matmul %234, %265, %cst_135 {dimension_numbers = #tpu.dot_dimension_numbers<[1], [0], [0], [1], [0, 0, 1, 1], [], []>} : vector<8x128xf32>, vector<128x128xf32>, vector<8x128xf32> -> vector<8x128xf32>
    %267 = vector.extract_strided_slice %237 {offsets = [0, 384], sizes = [8, 128], strides = [1, 1]} : vector<8x512xf32> to vector<8x128xf32>
    %268 = arith.addf %266, %267 : vector<8x128xf32>
    %cst_136 = arith.constant 5.000000e-01 : f32
    %269 = vector.broadcast %cst_136 : f32 to vector<8x128xf32>
    %270 = arith.mulf %269, %268 : vector<8x128xf32>
    %271 = math.tanh %270 : vector<8x128xf32>
    %cst_137 = arith.constant 1.000000e+00 : f32
    %272 = vector.broadcast %cst_137 : f32 to vector<8x128xf32>
    %273 = arith.addf %271, %272 : vector<8x128xf32>
    %cst_138 = arith.constant 5.000000e-01 : f32
    %274 = vector.broadcast %cst_138 : f32 to vector<8x128xf32>
    %275 = arith.mulf %274, %273 : vector<8x128xf32>
    %276 = arith.mulf %259, %232 : vector<8x128xf32>
    %277 = arith.mulf %248, %264 : vector<8x128xf32>
    %278 = arith.addf %276, %277 : vector<8x128xf32>
    %279 = math.tanh %278 : vector<8x128xf32>
    %280 = arith.mulf %275, %279 : vector<8x128xf32>
    %c6_i32 = arith.constant 6 : i32
    %281 = arith.index_cast %c6_i32 : i32 to index
    %c0_139 = arith.constant 0 : index
    %c0_140 = arith.constant 0 : index
    %282 = vector.load %arg2[%281, %c0_139, %c0_140] : memref<8x8x512xf32, #tpu.memory_space<vmem>>, vector<1x8x512xf32>
    %283 = vector.shape_cast %282 : vector<1x8x512xf32> to vector<8x512xf32>
    %c0_141 = arith.constant 0 : index
    %c0_142 = arith.constant 0 : index
    %284 = vector.load %arg3[%c0_141, %c0_142] : memref<128x512xf32, #tpu.memory_space<vmem>>, vector<128x128xf32>
    %cst_143 = arith.constant dense<0.000000e+00> : vector<8x128xf32>
    %285 = tpu.matmul %280, %284, %cst_143 {dimension_numbers = #tpu.dot_dimension_numbers<[1], [0], [0], [1], [0, 0, 1, 1], [], []>} : vector<8x128xf32>, vector<128x128xf32>, vector<8x128xf32> -> vector<8x128xf32>
    %286 = vector.extract_strided_slice %283 {offsets = [0, 0], sizes = [8, 128], strides = [1, 1]} : vector<8x512xf32> to vector<8x128xf32>
    %287 = arith.addf %285, %286 : vector<8x128xf32>
    %cst_144 = arith.constant 5.000000e-01 : f32
    %288 = vector.broadcast %cst_144 : f32 to vector<8x128xf32>
    %289 = arith.mulf %288, %287 : vector<8x128xf32>
    %290 = math.tanh %289 : vector<8x128xf32>
    %cst_145 = arith.constant 1.000000e+00 : f32
    %291 = vector.broadcast %cst_145 : f32 to vector<8x128xf32>
    %292 = arith.addf %290, %291 : vector<8x128xf32>
    %cst_146 = arith.constant 5.000000e-01 : f32
    %293 = vector.broadcast %cst_146 : f32 to vector<8x128xf32>
    %294 = arith.mulf %293, %292 : vector<8x128xf32>
    %c0_147 = arith.constant 0 : index
    %c128_148 = arith.constant 128 : index
    %295 = vector.load %arg3[%c0_147, %c128_148] : memref<128x512xf32, #tpu.memory_space<vmem>>, vector<128x128xf32>
    %cst_149 = arith.constant dense<0.000000e+00> : vector<8x128xf32>
    %296 = tpu.matmul %280, %295, %cst_149 {dimension_numbers = #tpu.dot_dimension_numbers<[1], [0], [0], [1], [0, 0, 1, 1], [], []>} : vector<8x128xf32>, vector<128x128xf32>, vector<8x128xf32> -> vector<8x128xf32>
    %297 = vector.extract_strided_slice %283 {offsets = [0, 128], sizes = [8, 128], strides = [1, 1]} : vector<8x512xf32> to vector<8x128xf32>
    %298 = arith.addf %296, %297 : vector<8x128xf32>
    %cst_150 = arith.constant 5.000000e-01 : f32
    %299 = vector.broadcast %cst_150 : f32 to vector<8x128xf32>
    %300 = arith.mulf %299, %298 : vector<8x128xf32>
    %301 = math.tanh %300 : vector<8x128xf32>
    %cst_151 = arith.constant 1.000000e+00 : f32
    %302 = vector.broadcast %cst_151 : f32 to vector<8x128xf32>
    %303 = arith.addf %301, %302 : vector<8x128xf32>
    %cst_152 = arith.constant 5.000000e-01 : f32
    %304 = vector.broadcast %cst_152 : f32 to vector<8x128xf32>
    %305 = arith.mulf %304, %303 : vector<8x128xf32>
    %c0_153 = arith.constant 0 : index
    %c256_154 = arith.constant 256 : index
    %306 = vector.load %arg3[%c0_153, %c256_154] : memref<128x512xf32, #tpu.memory_space<vmem>>, vector<128x128xf32>
    %cst_155 = arith.constant dense<0.000000e+00> : vector<8x128xf32>
    %307 = tpu.matmul %280, %306, %cst_155 {dimension_numbers = #tpu.dot_dimension_numbers<[1], [0], [0], [1], [0, 0, 1, 1], [], []>} : vector<8x128xf32>, vector<128x128xf32>, vector<8x128xf32> -> vector<8x128xf32>
    %308 = vector.extract_strided_slice %283 {offsets = [0, 256], sizes = [8, 128], strides = [1, 1]} : vector<8x512xf32> to vector<8x128xf32>
    %309 = arith.addf %307, %308 : vector<8x128xf32>
    %310 = math.tanh %309 : vector<8x128xf32>
    %c0_156 = arith.constant 0 : index
    %c384_157 = arith.constant 384 : index
    %311 = vector.load %arg3[%c0_156, %c384_157] : memref<128x512xf32, #tpu.memory_space<vmem>>, vector<128x128xf32>
    %cst_158 = arith.constant dense<0.000000e+00> : vector<8x128xf32>
    %312 = tpu.matmul %280, %311, %cst_158 {dimension_numbers = #tpu.dot_dimension_numbers<[1], [0], [0], [1], [0, 0, 1, 1], [], []>} : vector<8x128xf32>, vector<128x128xf32>, vector<8x128xf32> -> vector<8x128xf32>
    %313 = vector.extract_strided_slice %283 {offsets = [0, 384], sizes = [8, 128], strides = [1, 1]} : vector<8x512xf32> to vector<8x128xf32>
    %314 = arith.addf %312, %313 : vector<8x128xf32>
    %cst_159 = arith.constant 5.000000e-01 : f32
    %315 = vector.broadcast %cst_159 : f32 to vector<8x128xf32>
    %316 = arith.mulf %315, %314 : vector<8x128xf32>
    %317 = math.tanh %316 : vector<8x128xf32>
    %cst_160 = arith.constant 1.000000e+00 : f32
    %318 = vector.broadcast %cst_160 : f32 to vector<8x128xf32>
    %319 = arith.addf %317, %318 : vector<8x128xf32>
    %cst_161 = arith.constant 5.000000e-01 : f32
    %320 = vector.broadcast %cst_161 : f32 to vector<8x128xf32>
    %321 = arith.mulf %320, %319 : vector<8x128xf32>
    %322 = arith.mulf %305, %278 : vector<8x128xf32>
    %323 = arith.mulf %294, %310 : vector<8x128xf32>
    %324 = arith.addf %322, %323 : vector<8x128xf32>
    %325 = math.tanh %324 : vector<8x128xf32>
    %326 = arith.mulf %321, %325 : vector<8x128xf32>
    %c7_i32 = arith.constant 7 : i32
    %327 = arith.index_cast %c7_i32 : i32 to index
    %c0_162 = arith.constant 0 : index
    %c0_163 = arith.constant 0 : index
    %328 = vector.load %arg2[%327, %c0_162, %c0_163] : memref<8x8x512xf32, #tpu.memory_space<vmem>>, vector<1x8x512xf32>
    %329 = vector.shape_cast %328 : vector<1x8x512xf32> to vector<8x512xf32>
    %c0_164 = arith.constant 0 : index
    %c0_165 = arith.constant 0 : index
    %330 = vector.load %arg3[%c0_164, %c0_165] : memref<128x512xf32, #tpu.memory_space<vmem>>, vector<128x128xf32>
    %cst_166 = arith.constant dense<0.000000e+00> : vector<8x128xf32>
    %331 = tpu.matmul %326, %330, %cst_166 {dimension_numbers = #tpu.dot_dimension_numbers<[1], [0], [0], [1], [0, 0, 1, 1], [], []>} : vector<8x128xf32>, vector<128x128xf32>, vector<8x128xf32> -> vector<8x128xf32>
    %332 = vector.extract_strided_slice %329 {offsets = [0, 0], sizes = [8, 128], strides = [1, 1]} : vector<8x512xf32> to vector<8x128xf32>
    %333 = arith.addf %331, %332 : vector<8x128xf32>
    %cst_167 = arith.constant 5.000000e-01 : f32
    %334 = vector.broadcast %cst_167 : f32 to vector<8x128xf32>
    %335 = arith.mulf %334, %333 : vector<8x128xf32>
    %336 = math.tanh %335 : vector<8x128xf32>
    %cst_168 = arith.constant 1.000000e+00 : f32
    %337 = vector.broadcast %cst_168 : f32 to vector<8x128xf32>
    %338 = arith.addf %336, %337 : vector<8x128xf32>
    %cst_169 = arith.constant 5.000000e-01 : f32
    %339 = vector.broadcast %cst_169 : f32 to vector<8x128xf32>
    %340 = arith.mulf %339, %338 : vector<8x128xf32>
    %c0_170 = arith.constant 0 : index
    %c128_171 = arith.constant 128 : index
    %341 = vector.load %arg3[%c0_170, %c128_171] : memref<128x512xf32, #tpu.memory_space<vmem>>, vector<128x128xf32>
    %cst_172 = arith.constant dense<0.000000e+00> : vector<8x128xf32>
    %342 = tpu.matmul %326, %341, %cst_172 {dimension_numbers = #tpu.dot_dimension_numbers<[1], [0], [0], [1], [0, 0, 1, 1], [], []>} : vector<8x128xf32>, vector<128x128xf32>, vector<8x128xf32> -> vector<8x128xf32>
    %343 = vector.extract_strided_slice %329 {offsets = [0, 128], sizes = [8, 128], strides = [1, 1]} : vector<8x512xf32> to vector<8x128xf32>
    %344 = arith.addf %342, %343 : vector<8x128xf32>
    %cst_173 = arith.constant 5.000000e-01 : f32
    %345 = vector.broadcast %cst_173 : f32 to vector<8x128xf32>
    %346 = arith.mulf %345, %344 : vector<8x128xf32>
    %347 = math.tanh %346 : vector<8x128xf32>
    %cst_174 = arith.constant 1.000000e+00 : f32
    %348 = vector.broadcast %cst_174 : f32 to vector<8x128xf32>
    %349 = arith.addf %347, %348 : vector<8x128xf32>
    %cst_175 = arith.constant 5.000000e-01 : f32
    %350 = vector.broadcast %cst_175 : f32 to vector<8x128xf32>
    %351 = arith.mulf %350, %349 : vector<8x128xf32>
    %c0_176 = arith.constant 0 : index
    %c256_177 = arith.constant 256 : index
    %352 = vector.load %arg3[%c0_176, %c256_177] : memref<128x512xf32, #tpu.memory_space<vmem>>, vector<128x128xf32>
    %cst_178 = arith.constant dense<0.000000e+00> : vector<8x128xf32>
    %353 = tpu.matmul %326, %352, %cst_178 {dimension_numbers = #tpu.dot_dimension_numbers<[1], [0], [0], [1], [0, 0, 1, 1], [], []>} : vector<8x128xf32>, vector<128x128xf32>, vector<8x128xf32> -> vector<8x128xf32>
    %354 = vector.extract_strided_slice %329 {offsets = [0, 256], sizes = [8, 128], strides = [1, 1]} : vector<8x512xf32> to vector<8x128xf32>
    %355 = arith.addf %353, %354 : vector<8x128xf32>
    %356 = math.tanh %355 : vector<8x128xf32>
    %c0_179 = arith.constant 0 : index
    %c384_180 = arith.constant 384 : index
    %357 = vector.load %arg3[%c0_179, %c384_180] : memref<128x512xf32, #tpu.memory_space<vmem>>, vector<128x128xf32>
    %cst_181 = arith.constant dense<0.000000e+00> : vector<8x128xf32>
    %358 = tpu.matmul %326, %357, %cst_181 {dimension_numbers = #tpu.dot_dimension_numbers<[1], [0], [0], [1], [0, 0, 1, 1], [], []>} : vector<8x128xf32>, vector<128x128xf32>, vector<8x128xf32> -> vector<8x128xf32>
    %359 = vector.extract_strided_slice %329 {offsets = [0, 384], sizes = [8, 128], strides = [1, 1]} : vector<8x512xf32> to vector<8x128xf32>
    %360 = arith.addf %358, %359 : vector<8x128xf32>
    %cst_182 = arith.constant 5.000000e-01 : f32
    %361 = vector.broadcast %cst_182 : f32 to vector<8x128xf32>
    %362 = arith.mulf %361, %360 : vector<8x128xf32>
    %363 = math.tanh %362 : vector<8x128xf32>
    %cst_183 = arith.constant 1.000000e+00 : f32
    %364 = vector.broadcast %cst_183 : f32 to vector<8x128xf32>
    %365 = arith.addf %363, %364 : vector<8x128xf32>
    %cst_184 = arith.constant 5.000000e-01 : f32
    %366 = vector.broadcast %cst_184 : f32 to vector<8x128xf32>
    %367 = arith.mulf %366, %365 : vector<8x128xf32>
    %368 = arith.mulf %351, %324 : vector<8x128xf32>
    %369 = arith.mulf %340, %356 : vector<8x128xf32>
    %370 = arith.addf %368, %369 : vector<8x128xf32>
    %371 = math.tanh %370 : vector<8x128xf32>
    %372 = arith.mulf %367, %371 : vector<8x128xf32>
    %c8_i32 = arith.constant 8 : i32
    %c0_185 = arith.constant 0 : index
    %c0_186 = arith.constant 0 : index
    %373 = vector.load %arg4[%c0_185, %c0_186] : memref<8x128xf32, #tpu.memory_space<vmem>>, vector<8x128xf32>
    tpu.vector_store %arg4[%c0_185, %c0_186], %372 {strides = array<i32>} : memref<8x128xf32, #tpu.memory_space<vmem>>, vector<8x128xf32>,
    %c0_187 = arith.constant 0 : index
    %c0_188 = arith.constant 0 : index
    %374 = vector.load %arg5[%c0_187, %c0_188] : memref<8x128xf32, #tpu.memory_space<vmem>>, vector<8x128xf32>
    tpu.vector_store %arg5[%c0_187, %c0_188], %370 {strides = array<i32>} : memref<8x128xf32, #tpu.memory_space<vmem>>, vector<8x128xf32>,
    return
  }
  func.func @transform_0(%arg0: i32, %arg1: i32) -> (i32, i32, i32) {
    %c0_i32 = arith.constant 0 : i32
    %c0_i32_0 = arith.constant 0 : i32
    return %arg1, %arg0, %c0_i32 : i32, i32, i32
  }
  func.func @transform_1(%arg0: i32, %arg1: i32) -> (i32, i32) {
    %c0_i32 = arith.constant 0 : i32
    %c0_i32_0 = arith.constant 0 : i32
    %c0_i32_1 = arith.constant 0 : i32
    return %c0_i32, %c0_i32_0 : i32, i32
  }
  func.func @transform_2(%arg0: i32, %arg1: i32) -> (i32, i32) {
    %c0_i32 = arith.constant 0 : i32
    %c0_i32_0 = arith.constant 0 : i32
    return %arg0, %c0_i32 : i32, i32
  }
}

</mosaic_0001>

<bundles_post_ra>
// kernel: tpu_custom_call.1
= control target key start
LH: loop header
LB: loop body
LE: loop exit
PB: predicated region body
PF: predicated region fallthrough
CT: control target
= control target key end

     0   :  { %7 = vsyncpa [#allocation4], 0  ;;  %s5876_s0 = inlined_call_operand.hbm [shape: f32[8,8,512], index: 0, kind: input, shape index: {}]   ;;  %s5877_s1 = inlined_call_operand.hbm [shape: f32[128,512], index: 1, kind: input, shape index: {}]   ;;  %s5878_s2 = inlined_call_operand.hbm [shape: f32[8,128], index: 2, kind: output, shape index: {}]  }
   0x1   :  { %8 = vsyncpa [#allocation7], 0 }
   0x2   :  { %9 = vsyncpa [#allocation5], 0  ;;  %s5145_s9 = smov [#allocation3]   ;;  %s5073_s13 = scalar_lea.hbm %s5876_s0, 4096 }
   0x3   :  { %s15_s10 = sshll.u32 %s5145_s9, 4  ;;  %p5074_p0 = scmp.ne.s32.totalorder %s5876_s0, %s5073_s13  ;;  %s16_s10 = int_to_ptr.vmem [resolvable:$true] %s15_s10 }
   0x4   :  { %p5077_p1 = scmp.lt.u32.totalorder %s5073_s13, %s5876_s0 }
   0x6   :  { %p5079_p2 = pnand %p5077_p1, %p5074_p0 }
   0x8   :  { %5082 = shalt.err (!%p5079_p2)
}
   0x9   :  { %s5083_s18 = scalar_lea.vmem %s16_s10, 4096  ;;  %p5088_p4 = scmp.lt.s32.totalorder %s16_s10, %s16_s10 }
   0xa   :  { %p5084_p3 = scmp.ne.s32.totalorder %s16_s10, %s5083_s18  ;;  %p5089_p5 = scmp.lt.s32.totalorder %s5083_s18, %s5083_s18 }
   0xc   :  { %p5090_p6 = por %p5089_p5, %p5088_p4 }
   0xe   :  { %p5091_p7 = pnand %p5090_p6, %p5084_p3 }
  0x10   :  { %5094 = shalt.err (!%p5091_p7)
}
  0x11   :  { %s5146_s19 = smov 512   ;;  %s5147_s20 = smov 32  }
  0x12   :  { %21 = dma.hbm_to_vmem [thread:$0]  %s5876_s0, 4096, %s16_s10, [#allocation4], %s5146_s19, %s5146_s19, %s5147_s20  }
  0x13   :  { %s5148_s23 = smov [#allocation6]   ;;  %s5095_s27 = scalar_lea.hbm %s5877_s1, 8192 }
  0x14   :  { %s27_s24 = sshll.u32 %s5148_s23, 4  ;;  %p5096_p8 = scmp.ne.s32.totalorder %s5877_s1, %s5095_s27  ;;  %s28_s24 = int_to_ptr.vmem [resolvable:$true] %s27_s24 }
  0x15   :  { %p5099_p9 = scmp.lt.u32.totalorder %s5095_s27, %s5877_s1 }
  0x17   :  { %p5101_p10 = pnand %p5099_p9, %p5096_p8 }
  0x19   :  { %5104 = shalt.err (!%p5101_p10)
}
  0x1a   :  { %s5105_s4 = scalar_lea.vmem %s28_s24, 8192  ;;  %p5110_p12 = scmp.lt.s32.totalorder %s28_s24, %s28_s24 }
  0x1b   :  { %p5106_p11 = scmp.ne.s32.totalorder %s28_s24, %s5105_s4  ;;  %p5111_p13 = scmp.lt.s32.totalorder %s5105_s4, %s5105_s4 }
  0x1d   :  { %p5112_p0 = por %p5111_p13, %p5110_p12 }
  0x1f   :  { %p5113_p1 = pnand %p5112_p0, %p5106_p11 }
  0x21   :  { %5116 = shalt.err (!%p5113_p1)
}
  0x22   :  { %33 = dma.hbm_to_vmem [thread:$0]  %s5877_s1, 8192, %s28_s24, [#allocation7], %s5146_s19, %s5146_s19, %s5147_s20  }
  0x23   :  { %5139 = dma.done.wait [#allocation4], 4096  }
  0x24   :  { %5140 = vsyncadd [#allocation4], 4294963200 }
  0x25   :  { %5141 = dma.done.wait [#allocation7], 8192  }
  0x26   :  { %5142 = vsyncadd [#allocation7], 4294959104  ;;  %v5149_v0 = vmov 0.0|0.0   ;;  %vm5150_vm0 = vmmov 0   ;;  %v5151_v1 = vmov 0.0   ;;  %v52_v2 = vld [vmem:[#allocation6] sm:$0xff] }
  0x27   :  { %4217 = vmatprep.subr.bf16.mxu0 %v5149_v0  ;;  %4241 = vmatprep.subr.bf16.mxu1 %v5149_v0  ;;  %v53_v3 = vld [vmem:[#allocation6 + $0x20] sm:$0xff]  ;;  %v142_v7 = vld [vmem:[#allocation6 + $0x8] sm:$0xff]  ;;  %v232_v49 = vld [vmem:[#allocation6 + $0x10] sm:$0xff]  ;;  %s5152_s1 = smov [#allocation8]  }
  0x28   :  { %3129 = vmatprep.mubr.msk.f32.mxu0 %vm5150_vm0, %v5151_v1  ;;  %3164 = vmatprep.mubr.msk.f32.mxu1 %vm5150_vm0, %v5151_v1  ;;  %v54_v4 = vld [vmem:[#allocation6 + $0x40] sm:$0xff]  ;;  %v5198_v5 = vpack.c.bf16 %v53_v3, %v52_v2  ;;  %v143_v8 = vld [vmem:[#allocation6 + $0x28] sm:$0xff]  ;;  %v233_v50 = vld [vmem:[#allocation6 + $0x30] sm:$0xff]  ;;  %s2543_s6 = sshll.u32 %s5152_s1, 4  ;;  %s2544_s6 = int_to_ptr.vmem [resolvable:$true] %s2543_s6 }
  0x29   :  { %v55_v6 = vld [vmem:[#allocation6 + $0x60] sm:$0xff]  ;;  %v5203_v10 = vpack.c.bf16 %v143_v8, %v142_v7  ;;  %v144_v11 = vld [vmem:[#allocation6 + $0x48] sm:$0xff]  ;;  %v319_v52 = vld [vmem:[#allocation6 + $0x18] sm:$0xff]  ;;  %v5259_v54 = vpack.c.bf16 %v233_v50, %v232_v49  ;;  %s5117_s7 = scalar_lea.vmem %s2544_s6, 128  ;;  %p5122_p3 = scmp.lt.s32.totalorder %s2544_s6, %s2544_s6 }
  0x2a   :  { %4219 = vmatpush3.bf16.msra.mxu0 %v5198_v5  ;;  %v5201_v9 = vpack.c.bf16 %v55_v6, %v54_v4  ;;  %v145_v12 = vld [vmem:[#allocation6 + $0x68] sm:$0xff]  ;;  %v56_v13 = vld [vmem:[#allocation6 + $0x80] sm:$0xff]  ;;  %v320_v53 = vld [vmem:[#allocation6 + $0x38] sm:$0xff]  ;;  %p5118_p2 = scmp.ne.s32.totalorder %s2544_s6, %s5117_s7  ;;  %p5123_p4 = scmp.lt.s32.totalorder %s5117_s7, %s5117_s7 }
  0x2b   :  { %4220 = vmatprep.subr.bf16.mxu0 %v5149_v0  ;;  %v57_v14 = vld [vmem:[#allocation6 + $0xa0] sm:$0xff]  ;;  %4243 = vmatpush3.bf16.msra.mxu1 %v5203_v10  ;;  %v5207_v15 = vpack.c.bf16 %v145_v12, %v144_v11  ;;  %v146_v16 = vld [vmem:[#allocation6 + $0x88] sm:$0xff]  ;;  %v234_v55 = vld [vmem:[#allocation6 + $0x50] sm:$0xff]  ;;  %v5263_v57 = vpack.c.bf16 %v320_v53, %v319_v52 }
  0x2c   :  { %4244 = vmatprep.subr.bf16.mxu1 %v5149_v0  ;;  %v147_v17 = vld [vmem:[#allocation6 + $0xa8] sm:$0xff]  ;;  %v5211_v18 = vpack.c.bf16 %v57_v14, %v56_v13  ;;  %v58_v19 = vld [vmem:[#allocation6 + $0xc0] sm:$0xff]  ;;  %v235_v56 = vld [vmem:[#allocation6 + $0x70] sm:$0xff]  ;;  %p5124_p5 = por %p5123_p4, %p5122_p3 }
  0x2d   :  { %v59_v20 = vld [vmem:[#allocation6 + $0xe0] sm:$0xff]  ;;  %v5215_v21 = vpack.c.bf16 %v147_v17, %v146_v16  ;;  %v148_v22 = vld [vmem:[#allocation6 + $0xc8] sm:$0xff]  ;;  %v321_v58 = vld [vmem:[#allocation6 + $0x58] sm:$0xff]  ;;  %v5268_v60 = vpack.c.bf16 %v235_v56, %v234_v55 }
  0x2e   :  { %4222 = vmatpush3.bf16.msra.mxu0 %v5201_v9  ;;  %v149_v23 = vld [vmem:[#allocation6 + $0xe8] sm:$0xff]  ;;  %v5219_v24 = vpack.c.bf16 %v59_v20, %v58_v19  ;;  %v60_v25 = vld [vmem:[#allocation6 + $0x100] sm:$0xff]  ;;  %v322_v59 = vld [vmem:[#allocation6 + $0x78] sm:$0xff]  ;;  %p5125_p6 = pnand %p5124_p5, %p5118_p2 }
  0x2f   :  { %4223 = vmatprep.subr.bf16.mxu0 %v5149_v0  ;;  %4246 = vmatpush3.bf16.msra.mxu1 %v5207_v15  ;;  %v61_v26 = vld [vmem:[#allocation6 + $0x120] sm:$0xff]  ;;  %v5223_v27 = vpack.c.bf16 %v149_v23, %v148_v22  ;;  %v150_v28 = vld [vmem:[#allocation6 + $0x108] sm:$0xff]  ;;  %v236_v61 = vld [vmem:[#allocation6 + $0x90] sm:$0xff]  ;;  %v5275_v63 = vpack.c.bf16 %v322_v59, %v321_v58 }
  0x30   :  { %4247 = vmatprep.subr.bf16.mxu1 %v5149_v0  ;;  %v151_v29 = vld [vmem:[#allocation6 + $0x128] sm:$0xff]  ;;  %v5227_v30 = vpack.c.bf16 %v61_v26, %v60_v25  ;;  %v62_v31 = vld [vmem:[#allocation6 + $0x140] sm:$0xff]  ;;  %v237_v62 = vld [vmem:[#allocation6 + $0xb0] sm:$0xff] }
  0x31   :  { %v63_v32 = vld [vmem:[#allocation6 + $0x160] sm:$0xff]  ;;  %v5231_v33 = vpack.c.bf16 %v151_v29, %v150_v28  ;;  %v152_v34 = vld [vmem:[#allocation6 + $0x148] sm:$0xff]  ;;  %v323_v2 = vld [vmem:[#allocation6 + $0x98] sm:$0xff]  ;;  %v5281_v4 = vpack.c.bf16 %v237_v62, %v236_v61 }
  0x32   :  { %4225 = vmatpush3.bf16.msra.mxu0 %v5211_v18  ;;  %v153_v35 = vld [vmem:[#allocation6 + $0x168] sm:$0xff]  ;;  %v5235_v36 = vpack.c.bf16 %v63_v32, %v62_v31  ;;  %v64_v37 = vld [vmem:[#allocation6 + $0x180] sm:$0xff]  ;;  %v324_v3 = vld [vmem:[#allocation6 + $0xb8] sm:$0xff] }
  0x33   :  { %4226 = vmatprep.subr.bf16.mxu0 %v5149_v0  ;;  %4249 = vmatpush3.bf16.msra.mxu1 %v5215_v21  ;;  %v65_v38 = vld [vmem:[#allocation6 + $0x1a0] sm:$0xff]  ;;  %v5239_v39 = vpack.c.bf16 %v153_v35, %v152_v34  ;;  %v154_v40 = vld [vmem:[#allocation6 + $0x188] sm:$0xff]  ;;  %v238_v6 = vld [vmem:[#allocation6 + $0xd0] sm:$0xff]  ;;  %v5285_v8 = vpack.c.bf16 %v324_v3, %v323_v2 }
  0x34   :  { %4250 = vmatprep.subr.bf16.mxu1 %v5149_v0  ;;  %v155_v41 = vld [vmem:[#allocation6 + $0x1a8] sm:$0xff]  ;;  %v5243_v42 = vpack.c.bf16 %v65_v38, %v64_v37  ;;  %v66_v43 = vld [vmem:[#allocation6 + $0x1c0] sm:$0xff]  ;;  %v239_v7 = vld [vmem:[#allocation6 + $0xf0] sm:$0xff] }
  0x35   :  { %v67_v44 = vld [vmem:[#allocation6 + $0x1e0] sm:$0xff]  ;;  %v5247_v45 = vpack.c.bf16 %v155_v41, %v154_v40  ;;  %v156_v46 = vld [vmem:[#allocation6 + $0x1c8] sm:$0xff]  ;;  %v325_v11 = vld [vmem:[#allocation6 + $0xd8] sm:$0xff]  ;;  %v5289_v13 = vpack.c.bf16 %v239_v7, %v238_v6 }
  0x36   :  { %4228 = vmatpush3.bf16.msra.mxu0 %v5219_v24  ;;  %v157_v47 = vld [vmem:[#allocation6 + $0x1e8] sm:$0xff]  ;;  %v5251_v48 = vpack.c.bf16 %v67_v44, %v66_v43  ;;  %v326_v12 = vld [vmem:[#allocation6 + $0xf8] sm:$0xff]  ;;  %v240_v14 = vld [vmem:[#allocation6 + $0x110] sm:$0xff] }
  0x37   :  { %4229 = vmatprep.subr.bf16.mxu0 %v5149_v0  ;;  %4252 = vmatpush3.bf16.msra.mxu1 %v5223_v27  ;;  %v5255_v51 = vpack.c.bf16 %v157_v47, %v156_v46  ;;  %v241_v16 = vld [vmem:[#allocation6 + $0x130] sm:$0xff]  ;;  %v5293_v17 = vpack.c.bf16 %v326_v12, %v325_v11  ;;  %v327_v19 = vld [vmem:[#allocation6 + $0x118] sm:$0xff]  ;;  %v49_v58 = vld [vmem:[#allocation3 + $0x8] sm:$0xff] }
  0x38   :  { %4253 = vmatprep.subr.bf16.mxu1 %v5149_v0  ;;  %v328_v20 = vld [vmem:[#allocation6 + $0x138] sm:$0xff]  ;;  %v5297_v22 = vpack.c.bf16 %v241_v16, %v240_v14  ;;  %v242_v23 = vld [vmem:[#allocation6 + $0x150] sm:$0xff]  ;;  %v48_v59 = vld [vmem:[#allocation3] sm:$0xff] }
  0x39   :  { %v243_v25 = vld [vmem:[#allocation6 + $0x170] sm:$0xff]  ;;  %v5301_v26 = vpack.c.bf16 %v328_v20, %v327_v19  ;;  %v329_v28 = vld [vmem:[#allocation6 + $0x158] sm:$0xff] }
  0x3a   :  { %4231 = vmatpush3.bf16.msra.mxu0 %v5227_v30  ;;  %v330_v29 = vld [vmem:[#allocation6 + $0x178] sm:$0xff]  ;;  %v5305_v31 = vpack.c.bf16 %v243_v25, %v242_v23  ;;  %v244_v32 = vld [vmem:[#allocation6 + $0x190] sm:$0xff] }
  0x3b   :  { %4232 = vmatprep.subr.bf16.mxu0 %v5149_v0  ;;  %4255 = vmatpush3.bf16.msra.mxu1 %v5231_v33  ;;  %v245_v34 = vld [vmem:[#allocation6 + $0x1b0] sm:$0xff]  ;;  %v5309_v35 = vpack.c.bf16 %v330_v29, %v329_v28  ;;  %v331_v37 = vld [vmem:[#allocation6 + $0x198] sm:$0xff] }
  0x3c   :  { %4256 = vmatprep.subr.bf16.mxu1 %v5149_v0  ;;  %v332_v38 = vld [vmem:[#allocation6 + $0x1b8] sm:$0xff]  ;;  %v5313_v40 = vpack.c.bf16 %v245_v34, %v244_v32  ;;  %v246_v41 = vld [vmem:[#allocation6 + $0x1d0] sm:$0xff] }
  0x3d   :  { %v247_v43 = vld [vmem:[#allocation6 + $0x1f0] sm:$0xff]  ;;  %v5317_v44 = vpack.c.bf16 %v332_v38, %v331_v37  ;;  %v333_v46 = vld [vmem:[#allocation6 + $0x1d8] sm:$0xff] }
  0x3e   :  { %4234 = vmatpush3.bf16.msra.mxu0 %v5235_v36  ;;  %v334_v47 = vld [vmem:[#allocation6 + $0x1f8] sm:$0xff]  ;;  %v5321_v49 = vpack.c.bf16 %v247_v43, %v246_v41  ;;  %v50_v6 = vld [vmem:[#allocation3 + $0x10] sm:$0xff] }
  0x3f   :  { %4235 = vmatprep.subr.bf16.mxu0 %v5149_v0  ;;  %4258 = vmatpush3.bf16.msra.mxu1 %v5239_v39  ;;  %v5325_v50 = vpack.c.bf16 %v334_v47, %v333_v46  ;;  %v51_v11 = vld [vmem:[#allocation3 + $0x18] sm:$0xff] }
  0x40   :  { %4259 = vmatprep.subr.bf16.mxu1 %v5149_v0 }
  0x42   :  { %4237 = vmatpush3.bf16.msra.mxu0 %v5243_v42 }
  0x43   :  { %4238 = vmatprep.subr.bf16.mxu0 %v5149_v0  ;;  %4261 = vmatpush3.bf16.msra.mxu1 %v5247_v45 }
  0x44   :  { %4262 = vmatprep.subr.bf16.mxu1 %v5149_v0 }
  0x46   :  { %4240 = vmatpush3.bf16.msra.mxu0 %v5251_v48 }
  0x47   :  { %4265 = vmatprep.subr.bf16.mxu0 %v5149_v0  ;;  %4264 = vmatpush3.bf16.msra.mxu1 %v5255_v51 }
  0x48   :  { %4289 = vmatprep.subr.bf16.mxu1 %v5149_v0 }
  0x49   :  { %3130 = vmatmul.mubr.f32.vlgmr.msra.gmra.mrb[0].mxu0 %v5151_v1 }
  0x4a   :  { %4267 = vmatpush3.bf16.msra.mxu0 %v5259_v54  ;;  %3199 = vmatprep.mubr.msk.f32.mxu0 %vm5150_vm0, %v5151_v1 }
  0x4b   :  { %4268 = vmatprep.subr.bf16.mxu0 %v5149_v0  ;;  %3165 = vmatmul.mubr.f32.vlgmr.msra.gmra.mrb[0].mxu1 %v5151_v1 }
  0x4c   :  { %4291 = vmatpush3.bf16.msra.mxu1 %v5263_v57  ;;  %3234 = vmatprep.mubr.msk.f32.mxu1 %vm5150_vm0, %v5151_v1 }
  0x4d   :  { %4292 = vmatprep.subr.bf16.mxu1 %v5149_v0 }
  0x4e   :  { %4270 = vmatpush3.bf16.msra.mxu0 %v5268_v60 }
  0x4f   :  { %4271 = vmatprep.subr.bf16.mxu0 %v5149_v0 }
  0x50   :  { %4294 = vmatpush3.bf16.msra.mxu1 %v5275_v63 }
  0x51   :  { %4295 = vmatprep.subr.bf16.mxu1 %v5149_v0 }
  0x52   :  { %4273 = vmatpush3.bf16.msra.mxu0 %v5281_v4 }
  0x53   :  { %4274 = vmatprep.subr.bf16.mxu0 %v5149_v0 }
  0x54   :  { %4297 = vmatpush3.bf16.msra.mxu1 %v5285_v8 }
  0x55   :  { %4298 = vmatprep.subr.bf16.mxu1 %v5149_v0 }
  0x56   :  { %4276 = vmatpush3.bf16.msra.mxu0 %v5289_v13 }
  0x57   :  { %4277 = vmatprep.subr.bf16.mxu0 %v5149_v0 }
  0x58   :  { %4300 = vmatpush3.bf16.msra.mxu1 %v5293_v17 }
  0x59   :  { %4301 = vmatprep.subr.bf16.mxu1 %v5149_v0 }
  0x5a   :  { %4279 = vmatpush3.bf16.msra.mxu0 %v5297_v22 }
  0x5b   :  { %4280 = vmatprep.subr.bf16.mxu0 %v5149_v0 }
  0x5c   :  { %4303 = vmatpush3.bf16.msra.mxu1 %v5301_v26 }
  0x5d   :  { %4304 = vmatprep.subr.bf16.mxu1 %v5149_v0 }
  0x5e   :  { %4282 = vmatpush3.bf16.msra.mxu0 %v5305_v31 }
  0x5f   :  { %4283 = vmatprep.subr.bf16.mxu0 %v5149_v0 }
  0x60   :  { %4306 = vmatpush3.bf16.msra.mxu1 %v5309_v35 }
  0x61   :  { %4307 = vmatprep.subr.bf16.mxu1 %v5149_v0 }
  0x62   :  { %4285 = vmatpush3.bf16.msra.mxu0 %v5313_v40 }
  0x63   :  { %4286 = vmatprep.subr.bf16.mxu0 %v5149_v0 }
  0x64   :  { %4309 = vmatpush3.bf16.msra.mxu1 %v5317_v44 }
  0x65   :  { %4310 = vmatprep.subr.bf16.mxu1 %v5149_v0 }
  0x66   :  { %4288 = vmatpush3.bf16.msra.mxu0 %v5321_v49 }
  0x67   :  { %4313 = vmatprep.subr.bf16.mxu0 %v5149_v0 }
  0x68   :  { %4312 = vmatpush3.bf16.msra.mxu1 %v5325_v50 }
  0x69   :  { %3200 = vmatmul.mubr.f32.vlgmr.msra.gmra.mrb[2].mxu0 %v5151_v1  ;;  %4337 = vmatprep.subr.bf16.mxu1 %v5149_v0 }
  0x6a   :  { %4315 = vmatpush3.bf16.msra.mxu0 %v5198_v5  ;;  %3269 = vmatprep.mubr.msk.f32.mxu0 %vm5150_vm0, %v5151_v1 }
  0x6b   :  { %3235 = vmatmul.mubr.f32.vlgmr.msra.gmra.mrb[2].mxu1 %v5151_v1  ;;  %4316 = vmatprep.subr.bf16.mxu0 %v5149_v0 }
  0x6c   :  { %4339 = vmatpush3.bf16.msra.mxu1 %v5203_v10  ;;  %3304 = vmatprep.mubr.msk.f32.mxu1 %vm5150_vm0, %v5151_v1 }
  0x6d   :  { %4340 = vmatprep.subr.bf16.mxu1 %v5149_v0 }
  0x6e   :  { %4318 = vmatpush3.bf16.msra.mxu0 %v5201_v9 }
  0x6f   :  { %4319 = vmatprep.subr.bf16.mxu0 %v5149_v0 }
  0x70   :  { %4342 = vmatpush3.bf16.msra.mxu1 %v5207_v15 }
  0x71   :  { %4343 = vmatprep.subr.bf16.mxu1 %v5149_v0 }
  0x72   :  { %4321 = vmatpush3.bf16.msra.mxu0 %v5211_v18 }
  0x73   :  { %4322 = vmatprep.subr.bf16.mxu0 %v5149_v0 }
  0x74   :  { %4345 = vmatpush3.bf16.msra.mxu1 %v5215_v21 }
  0x75   :  { %4346 = vmatprep.subr.bf16.mxu1 %v5149_v0 }
  0x76   :  { %4324 = vmatpush3.bf16.msra.mxu0 %v5219_v24 }
  0x77   :  { %4325 = vmatprep.subr.bf16.mxu0 %v5149_v0 }
  0x78   :  { %4348 = vmatpush3.bf16.msra.mxu1 %v5223_v27 }
  0x79   :  { %4349 = vmatprep.subr.bf16.mxu1 %v5149_v0 }
  0x7a   :  { %4327 = vmatpush3.bf16.msra.mxu0 %v5227_v30 }
  0x7b   :  { %4328 = vmatprep.subr.bf16.mxu0 %v5149_v0 }
  0x7c   :  { %4351 = vmatpush3.bf16.msra.mxu1 %v5231_v33 }
  0x7d   :  { %4352 = vmatprep.subr.bf16.mxu1 %v5149_v0 }
  0x7e   :  { %4330 = vmatpush3.bf16.msra.mxu0 %v5235_v36 }
  0x7f   :  { %4331 = vmatprep.subr.bf16.mxu0 %v5149_v0 }
  0x80   :  { %4354 = vmatpush3.bf16.msra.mxu1 %v5239_v39 }
  0x81   :  { %4355 = vmatprep.subr.bf16.mxu1 %v5149_v0 }
  0x82   :  { %4333 = vmatpush3.bf16.msra.mxu0 %v5243_v42 }
  0x83   :  { %4334 = vmatprep.subr.bf16.mxu0 %v5149_v0 }
  0x84   :  { %4357 = vmatpush3.bf16.msra.mxu1 %v5247_v45 }
  0x85   :  { %4358 = vmatprep.subr.bf16.mxu1 %v5149_v0 }
  0x86   :  { %4336 = vmatpush3.bf16.msra.mxu0 %v5251_v48 }
  0x87   :  { %4361 = vmatprep.subr.bf16.mxu0 %v5149_v0 }
  0x88   :  { %4360 = vmatpush3.bf16.msra.mxu1 %v5255_v51 }
  0x89   :  { %4385 = vmatprep.subr.bf16.mxu1 %v5149_v0 }
 0x11c   :  { %v134_v52 = vpop.f32.mrb[0].mxu0 }
 0x11d   :  { %v3131_v53 = vpop.f32.mrb[1].mxu0  ;;  %v135_v62 = vadd.f32 %v134_v52, %v48_v59 }
 0x11e   :  { %v224_v55 = vpop.f32.mrb[0].mxu1 }
 0x11f   :  { %v3166_v56 = vpop.f32.mrb[1].mxu1  ;;  %v225_v61 = vadd.f32 %v224_v55, %v49_v58  ;;  %v138_v3 = vmul.f32 0.5, %v135_v62 }
 0x121   :  { %v228_v2 = vmul.f32 0.5, %v225_v61 }
 0x123   :  { %4993 = vtanh.f32 %v228_v2  ;;  %v416_v2 = vld [vmem:[#allocation3 + $0x28] sm:$0xff] }
 0x124   :  { %4995 = vtanh.f32 %v138_v3  ;;  %v415_v3 = vld [vmem:[#allocation3 + $0x20] sm:$0xff] }
 0x12d   :  { %v4994_v19 = vpop.eup %4993 }
 0x12e   :  { %v4996_v25 = vpop.eup %4995  ;;  %v230_v29 = vadd.f32 1.0, %v4994_v19 }
 0x12f   :  { %v140_v32 = vadd.f32 1.0, %v4996_v25 }
 0x130   :  { %v231_v34 = vmul.f32 0.5, %v230_v29 }
 0x131   :  { %v141_v37 = vmul.f32 0.5, %v140_v32 }
 0x132   :  { %v409_v41 = vmul.f32 0.0, %v231_v34 }
 0x13c   :  { %v314_v7 = vpop.f32.mrb[2].mxu0 }
 0x13d   :  { %v315_v12 = vadd.f32 %v314_v7, %v50_v6  ;;  %v3201_v14 = vpop.f32.mrb[3].mxu0 }
 0x13e   :  { %v401_v16 = vpop.f32.mrb[2].mxu1  ;;  %v417_v14 = vld [vmem:[#allocation3 + $0x30] sm:$0xff] }
 0x13f   :  { %4997 = vtanh.f32 %v315_v12  ;;  %v402_v20 = vadd.f32 %v401_v16, %v51_v11  ;;  %v3236_v23 = vpop.f32.mrb[3].mxu1  ;;  %v418_v16 = vld [vmem:[#allocation3 + $0x38] sm:$0xff] }
 0x141   :  { %v405_v28 = vmul.f32 0.5, %v402_v20 }
 0x143   :  { %4999 = vtanh.f32 %v405_v28 }
 0x149   :  { %v4998_v38 = vpop.eup %4997 }
 0x14a   :  { %v410_v43 = vmul.f32 %v4998_v38, %v141_v37 }
 0x14c   :  { %v5370_v46 = vadd.f32 %v410_v43, %v409_v41 }
 0x14d   :  { %v5000_v47 = vpop.eup %4999 }
 0x14e   :  { %5001 = vtanh.f32 %v5370_v46  ;;  %v407_v52 = vadd.f32 1.0, %v5000_v47 }
 0x150   :  { %v408_v53 = vmul.f32 0.5, %v407_v52 }
 0x158   :  { %v5002_v55 = vpop.eup %5001 }
 0x159   :  { %v413_v56 = vmul.f32 %v5002_v55, %v408_v53 }
 0x15b   :  { %3270 = vmatmul.mubr.f32.vlgmr.msra.gmra.mrb[4].mxu0 %v413_v56  ;;  %3305 = vmatmul.mubr.f32.vlgmr.msra.gmra.mrb[4].mxu1 %v413_v56 }
 0x15c   :  { %4363 = vmatpush3.bf16.msra.mxu0 %v5259_v54  ;;  %4387 = vmatpush3.bf16.msra.mxu1 %v5263_v57 }
 0x15d   :  { %4364 = vmatprep.subr.bf16.mxu0 %v5149_v0  ;;  %4388 = vmatprep.subr.bf16.mxu1 %v5149_v0 }
 0x15e   :  { %3339 = vmatprep.mubr.msk.f32.mxu0 %vm5150_vm0, %v5151_v1  ;;  %3374 = vmatprep.mubr.msk.f32.mxu1 %vm5150_vm0, %v5151_v1 }
 0x160   :  { %4366 = vmatpush3.bf16.msra.mxu0 %v5268_v60  ;;  %4390 = vmatpush3.bf16.msra.mxu1 %v5275_v63 }
 0x161   :  { %4367 = vmatprep.subr.bf16.mxu0 %v5149_v0  ;;  %4391 = vmatprep.subr.bf16.mxu1 %v5149_v0 }
 0x164   :  { %4369 = vmatpush3.bf16.msra.mxu0 %v5281_v4  ;;  %4393 = vmatpush3.bf16.msra.mxu1 %v5285_v8 }
 0x165   :  { %4370 = vmatprep.subr.bf16.mxu0 %v5149_v0  ;;  %4394 = vmatprep.subr.bf16.mxu1 %v5149_v0 }
 0x168   :  { %4372 = vmatpush3.bf16.msra.mxu0 %v5289_v13  ;;  %4396 = vmatpush3.bf16.msra.mxu1 %v5293_v17 }
 0x169   :  { %4373 = vmatprep.subr.bf16.mxu0 %v5149_v0  ;;  %4397 = vmatprep.subr.bf16.mxu1 %v5149_v0 }
 0x16c   :  { %4375 = vmatpush3.bf16.msra.mxu0 %v5297_v22  ;;  %4399 = vmatpush3.bf16.msra.mxu1 %v5301_v26 }
 0x16d   :  { %4376 = vmatprep.subr.bf16.mxu0 %v5149_v0  ;;  %4400 = vmatprep.subr.bf16.mxu1 %v5149_v0 }
 0x170   :  { %4378 = vmatpush3.bf16.msra.mxu0 %v5305_v31  ;;  %4402 = vmatpush3.bf16.msra.mxu1 %v5309_v35 }
 0x171   :  { %4379 = vmatprep.subr.bf16.mxu0 %v5149_v0  ;;  %4403 = vmatprep.subr.bf16.mxu1 %v5149_v0 }
 0x174   :  { %4381 = vmatpush3.bf16.msra.mxu0 %v5313_v40  ;;  %4405 = vmatpush3.bf16.msra.mxu1 %v5317_v44 }
 0x175   :  { %4382 = vmatprep.subr.bf16.mxu0 %v5149_v0  ;;  %4406 = vmatprep.subr.bf16.mxu1 %v5149_v0 }
 0x178   :  { %4384 = vmatpush3.bf16.msra.mxu0 %v5321_v49  ;;  %4408 = vmatpush3.bf16.msra.mxu1 %v5325_v50 }
 0x179   :  { %4409 = vmatprep.subr.bf16.mxu0 %v5149_v0  ;;  %4433 = vmatprep.subr.bf16.mxu1 %v5149_v0 }
 0x17b   :  { %3340 = vmatmul.mubr.f32.vlgmr.msra.gmra.mrb[6].mxu0 %v413_v56  ;;  %3375 = vmatmul.mubr.f32.vlgmr.msra.gmra.mrb[6].mxu1 %v413_v56 }
 0x17c   :  { %4411 = vmatpush3.bf16.msra.mxu0 %v5198_v5  ;;  %4435 = vmatpush3.bf16.msra.mxu1 %v5203_v10 }
 0x17d   :  { %4412 = vmatprep.subr.bf16.mxu0 %v5149_v0  ;;  %4436 = vmatprep.subr.bf16.mxu1 %v5149_v0 }
 0x17e   :  { %3409 = vmatprep.mubr.msk.f32.mxu0 %vm5150_vm0, %v5151_v1  ;;  %3444 = vmatprep.mubr.msk.f32.mxu1 %vm5150_vm0, %v5151_v1 }
 0x180   :  { %4414 = vmatpush3.bf16.msra.mxu0 %v5201_v9  ;;  %4438 = vmatpush3.bf16.msra.mxu1 %v5207_v15 }
 0x181   :  { %4415 = vmatprep.subr.bf16.mxu0 %v5149_v0  ;;  %4439 = vmatprep.subr.bf16.mxu1 %v5149_v0 }
 0x184   :  { %4417 = vmatpush3.bf16.msra.mxu0 %v5211_v18  ;;  %4441 = vmatpush3.bf16.msra.mxu1 %v5215_v21 }
 0x185   :  { %4418 = vmatprep.subr.bf16.mxu0 %v5149_v0  ;;  %4442 = vmatprep.subr.bf16.mxu1 %v5149_v0 }
 0x188   :  { %4420 = vmatpush3.bf16.msra.mxu0 %v5219_v24  ;;  %4444 = vmatpush3.bf16.msra.mxu1 %v5223_v27 }
 0x189   :  { %4421 = vmatprep.subr.bf16.mxu0 %v5149_v0  ;;  %4445 = vmatprep.subr.bf16.mxu1 %v5149_v0 }
 0x18c   :  { %4423 = vmatpush3.bf16.msra.mxu0 %v5227_v30  ;;  %4447 = vmatpush3.bf16.msra.mxu1 %v5231_v33 }
 0x18d   :  { %4424 = vmatprep.subr.bf16.mxu0 %v5149_v0  ;;  %4448 = vmatprep.subr.bf16.mxu1 %v5149_v0 }
 0x190   :  { %4426 = vmatpush3.bf16.msra.mxu0 %v5235_v36  ;;  %4450 = vmatpush3.bf16.msra.mxu1 %v5239_v39 }
 0x191   :  { %4427 = vmatprep.subr.bf16.mxu0 %v5149_v0  ;;  %4451 = vmatprep.subr.bf16.mxu1 %v5149_v0 }
 0x194   :  { %4429 = vmatpush3.bf16.msra.mxu0 %v5243_v42  ;;  %4453 = vmatpush3.bf16.msra.mxu1 %v5247_v45 }
 0x195   :  { %4430 = vmatprep.subr.bf16.mxu0 %v5149_v0  ;;  %4454 = vmatprep.subr.bf16.mxu1 %v5149_v0 }
 0x198   :  { %4432 = vmatpush3.bf16.msra.mxu0 %v5251_v48  ;;  %4456 = vmatpush3.bf16.msra.mxu1 %v5255_v51 }
 0x199   :  { %4457 = vmatprep.subr.bf16.mxu0 %v5149_v0  ;;  %4481 = vmatprep.subr.bf16.mxu1 %v5149_v0 }
 0x22e   :  { %v485_v58 = vpop.f32.mrb[4].mxu0  ;;  %v559_v59 = vpop.f32.mrb[4].mxu1 }
 0x22f   :  { %v3271_v61 = vpop.f32.mrb[5].mxu0  ;;  %v3306_v62 = vpop.f32.mrb[5].mxu1  ;;  %v560_v6 = vadd.f32 %v559_v59, %v416_v2  ;;  %v486_v7 = vadd.f32 %v485_v58, %v415_v3 }
 0x231   :  { %v563_v11 = vmul.f32 0.5, %v560_v6  ;;  %v489_v12 = vmul.f32 0.5, %v486_v7 }
 0x233   :  { %5003 = vtanh.f32 %v563_v11  ;;  %v719_v11 = vld [vmem:[#allocation3 + $0x48] sm:$0xff] }
 0x234   :  { %5005 = vtanh.f32 %v489_v12  ;;  %v718_v12 = vld [vmem:[#allocation3 + $0x40] sm:$0xff] }
 0x23d   :  { %v5004_v32 = vpop.eup %5003 }
 0x23e   :  { %v5006_v34 = vpop.eup %5005  ;;  %v565_v37 = vadd.f32 1.0, %v5004_v32 }
 0x23f   :  { %v491_v41 = vadd.f32 1.0, %v5006_v34 }
 0x240   :  { %v566_v43 = vmul.f32 0.5, %v565_v37 }
 0x241   :  { %v492_v47 = vmul.f32 0.5, %v491_v41 }
 0x242   :  { %v712_v53 = vmul.f32 %v566_v43, %v5370_v46 }
 0x24e   :  { %v633_v19 = vpop.f32.mrb[6].mxu0  ;;  %v704_v20 = vpop.f32.mrb[6].mxu1 }
 0x24f   :  { %v634_v23 = vadd.f32 %v633_v19, %v417_v14  ;;  %v3341_v25 = vpop.f32.mrb[7].mxu0  ;;  %v3376_v28 = vpop.f32.mrb[7].mxu1  ;;  %v705_v29 = vadd.f32 %v704_v20, %v418_v16 }
 0x250   :  { %v721_v25 = vld [vmem:[#allocation3 + $0x58] sm:$0xff] }
 0x251   :  { %5007 = vtanh.f32 %v634_v23  ;;  %v708_v38 = vmul.f32 0.5, %v705_v29  ;;  %v720_v23 = vld [vmem:[#allocation3 + $0x50] sm:$0xff] }
 0x253   :  { %5009 = vtanh.f32 %v708_v38 }
 0x25b   :  { %v5008_v52 = vpop.eup %5007 }
 0x25c   :  { %v713_v55 = vmul.f32 %v5008_v52, %v492_v47 }
 0x25d   :  { %v5010_v58 = vpop.eup %5009 }
 0x25e   :  { %v5446_v56 = vadd.f32 %v713_v55, %v712_v53  ;;  %v710_v59 = vadd.f32 1.0, %v5010_v58 }
 0x260   :  { %5011 = vtanh.f32 %v5446_v56  ;;  %v711_v61 = vmul.f32 0.5, %v710_v59 }
 0x26a   :  { %v5012_v62 = vpop.eup %5011 }
 0x26b   :  { %v716_v2 = vmul.f32 %v5012_v62, %v711_v61 }
 0x26d   :  { %3410 = vmatmul.mubr.f32.vlgmr.msra.gmra.mrb[8].mxu0 %v716_v2  ;;  %3445 = vmatmul.mubr.f32.vlgmr.msra.gmra.mrb[8].mxu1 %v716_v2 }
 0x26e   :  { %4459 = vmatpush3.bf16.msra.mxu0 %v5259_v54  ;;  %4483 = vmatpush3.bf16.msra.mxu1 %v5263_v57 }
 0x26f   :  { %4460 = vmatprep.subr.bf16.mxu0 %v5149_v0  ;;  %4484 = vmatprep.subr.bf16.mxu1 %v5149_v0 }
 0x270   :  { %3479 = vmatprep.mubr.msk.f32.mxu0 %vm5150_vm0, %v5151_v1  ;;  %3514 = vmatprep.mubr.msk.f32.mxu1 %vm5150_vm0, %v5151_v1 }
 0x272   :  { %4462 = vmatpush3.bf16.msra.mxu0 %v5268_v60  ;;  %4486 = vmatpush3.bf16.msra.mxu1 %v5275_v63 }
 0x273   :  { %4463 = vmatprep.subr.bf16.mxu0 %v5149_v0  ;;  %4487 = vmatprep.subr.bf16.mxu1 %v5149_v0 }
 0x276   :  { %4465 = vmatpush3.bf16.msra.mxu0 %v5281_v4  ;;  %4489 = vmatpush3.bf16.msra.mxu1 %v5285_v8 }
 0x277   :  { %4466 = vmatprep.subr.bf16.mxu0 %v5149_v0  ;;  %4490 = vmatprep.subr.bf16.mxu1 %v5149_v0 }
 0x27a   :  { %4468 = vmatpush3.bf16.msra.mxu0 %v5289_v13  ;;  %4492 = vmatpush3.bf16.msra.mxu1 %v5293_v17 }
 0x27b   :  { %4469 = vmatprep.subr.bf16.mxu0 %v5149_v0  ;;  %4493 = vmatprep.subr.bf16.mxu1 %v5149_v0 }
 0x27e   :  { %4471 = vmatpush3.bf16.msra.mxu0 %v5297_v22  ;;  %4495 = vmatpush3.bf16.msra.mxu1 %v5301_v26 }
 0x27f   :  { %4472 = vmatprep.subr.bf16.mxu0 %v5149_v0  ;;  %4496 = vmatprep.subr.bf16.mxu1 %v5149_v0 }
 0x282   :  { %4474 = vmatpush3.bf16.msra.mxu0 %v5305_v31  ;;  %4498 = vmatpush3.bf16.msra.mxu1 %v5309_v35 }
 0x283   :  { %4475 = vmatprep.subr.bf16.mxu0 %v5149_v0  ;;  %4499 = vmatprep.subr.bf16.mxu1 %v5149_v0 }
 0x286   :  { %4477 = vmatpush3.bf16.msra.mxu0 %v5313_v40  ;;  %4501 = vmatpush3.bf16.msra.mxu1 %v5317_v44 }
 0x287   :  { %4478 = vmatprep.subr.bf16.mxu0 %v5149_v0  ;;  %4502 = vmatprep.subr.bf16.mxu1 %v5149_v0 }
 0x28a   :  { %4480 = vmatpush3.bf16.msra.mxu0 %v5321_v49  ;;  %4504 = vmatpush3.bf16.msra.mxu1 %v5325_v50 }
 0x28b   :  { %4505 = vmatprep.subr.bf16.mxu0 %v5149_v0  ;;  %4529 = vmatprep.subr.bf16.mxu1 %v5149_v0 }
 0x28d   :  { %3480 = vmatmul.mubr.f32.vlgmr.msra.gmra.mrb[10].mxu0 %v716_v2  ;;  %3515 = vmatmul.mubr.f32.vlgmr.msra.gmra.mrb[10].mxu1 %v716_v2 }
 0x28e   :  { %4507 = vmatpush3.bf16.msra.mxu0 %v5198_v5  ;;  %4531 = vmatpush3.bf16.msra.mxu1 %v5203_v10 }
 0x28f   :  { %4508 = vmatprep.subr.bf16.mxu0 %v5149_v0  ;;  %4532 = vmatprep.subr.bf16.mxu1 %v5149_v0 }
 0x290   :  { %3549 = vmatprep.mubr.msk.f32.mxu0 %vm5150_vm0, %v5151_v1  ;;  %3584 = vmatprep.mubr.msk.f32.mxu1 %vm5150_vm0, %v5151_v1 }
 0x292   :  { %4510 = vmatpush3.bf16.msra.mxu0 %v5201_v9  ;;  %4534 = vmatpush3.bf16.msra.mxu1 %v5207_v15 }
 0x293   :  { %4511 = vmatprep.subr.bf16.mxu0 %v5149_v0  ;;  %4535 = vmatprep.subr.bf16.mxu1 %v5149_v0 }
 0x296   :  { %4513 = vmatpush3.bf16.msra.mxu0 %v5211_v18  ;;  %4537 = vmatpush3.bf16.msra.mxu1 %v5215_v21 }
 0x297   :  { %4514 = vmatprep.subr.bf16.mxu0 %v5149_v0  ;;  %4538 = vmatprep.subr.bf16.mxu1 %v5149_v0 }
 0x29a   :  { %4516 = vmatpush3.bf16.msra.mxu0 %v5219_v24  ;;  %4540 = vmatpush3.bf16.msra.mxu1 %v5223_v27 }
 0x29b   :  { %4517 = vmatprep.subr.bf16.mxu0 %v5149_v0  ;;  %4541 = vmatprep.subr.bf16.mxu1 %v5149_v0 }
 0x29e   :  { %4519 = vmatpush3.bf16.msra.mxu0 %v5227_v30  ;;  %4543 = vmatpush3.bf16.msra.mxu1 %v5231_v33 }
 0x29f   :  { %4520 = vmatprep.subr.bf16.mxu0 %v5149_v0  ;;  %4544 = vmatprep.subr.bf16.mxu1 %v5149_v0 }
 0x2a2   :  { %4522 = vmatpush3.bf16.msra.mxu0 %v5235_v36  ;;  %4546 = vmatpush3.bf16.msra.mxu1 %v5239_v39 }
 0x2a3   :  { %4523 = vmatprep.subr.bf16.mxu0 %v5149_v0  ;;  %4547 = vmatprep.subr.bf16.mxu1 %v5149_v0 }
 0x2a6   :  { %4525 = vmatpush3.bf16.msra.mxu0 %v5243_v42  ;;  %4549 = vmatpush3.bf16.msra.mxu1 %v5247_v45 }
 0x2a7   :  { %4526 = vmatprep.subr.bf16.mxu0 %v5149_v0  ;;  %4550 = vmatprep.subr.bf16.mxu1 %v5149_v0 }
 0x2aa   :  { %4528 = vmatpush3.bf16.msra.mxu0 %v5251_v48  ;;  %4552 = vmatpush3.bf16.msra.mxu1 %v5255_v51 }
 0x2ab   :  { %4553 = vmatprep.subr.bf16.mxu0 %v5149_v0  ;;  %4577 = vmatprep.subr.bf16.mxu1 %v5149_v0 }
 0x340   :  { %v788_v46 = vpop.f32.mrb[8].mxu0  ;;  %v862_v3 = vpop.f32.mrb[8].mxu1 }
 0x341   :  { %v3411_v6 = vpop.f32.mrb[9].mxu0  ;;  %v3446_v7 = vpop.f32.mrb[9].mxu1  ;;  %v863_v14 = vadd.f32 %v862_v3, %v719_v11  ;;  %v789_v16 = vadd.f32 %v788_v46, %v718_v12 }
 0x343   :  { %v866_v19 = vmul.f32 0.5, %v863_v14  ;;  %v792_v20 = vmul.f32 0.5, %v789_v16 }
 0x345   :  { %5013 = vtanh.f32 %v866_v19  ;;  %v1022_v19 = vld [vmem:[#allocation3 + $0x68] sm:$0xff] }
 0x346   :  { %5015 = vtanh.f32 %v792_v20  ;;  %v1021_v20 = vld [vmem:[#allocation3 + $0x60] sm:$0xff] }
 0x34f   :  { %v5014_v41 = vpop.eup %5013 }
 0x350   :  { %v5016_v43 = vpop.eup %5015  ;;  %v868_v47 = vadd.f32 1.0, %v5014_v41 }
 0x351   :  { %v794_v53 = vadd.f32 1.0, %v5016_v43 }
 0x352   :  { %v869_v55 = vmul.f32 0.5, %v868_v47 }
 0x353   :  { %v795_v58 = vmul.f32 0.5, %v794_v53 }
 0x354   :  { %v1015_v61 = vmul.f32 %v869_v55, %v5446_v56 }
 0x360   :  { %v936_v28 = vpop.f32.mrb[10].mxu0  ;;  %v1007_v29 = vpop.f32.mrb[10].mxu1 }
 0x361   :  { %v937_v32 = vadd.f32 %v936_v28, %v720_v23  ;;  %v3481_v34 = vpop.f32.mrb[11].mxu0  ;;  %v3516_v37 = vpop.f32.mrb[11].mxu1  ;;  %v1008_v38 = vadd.f32 %v1007_v29, %v721_v25 }
 0x362   :  { %v1024_v34 = vld [vmem:[#allocation3 + $0x78] sm:$0xff] }
 0x363   :  { %5017 = vtanh.f32 %v937_v32  ;;  %v1011_v52 = vmul.f32 0.5, %v1008_v38  ;;  %v1023_v32 = vld [vmem:[#allocation3 + $0x70] sm:$0xff] }
 0x365   :  { %5019 = vtanh.f32 %v1011_v52 }
 0x36d   :  { %v5018_v59 = vpop.eup %5017 }
 0x36e   :  { %v1016_v62 = vmul.f32 %v5018_v59, %v795_v58 }
 0x36f   :  { %v5020_v46 = vpop.eup %5019 }
 0x370   :  { %v5522_v2 = vadd.f32 %v1016_v62, %v1015_v61  ;;  %v1013_v3 = vadd.f32 1.0, %v5020_v46 }
 0x372   :  { %5021 = vtanh.f32 %v5522_v2  ;;  %v1014_v6 = vmul.f32 0.5, %v1013_v3 }
 0x37c   :  { %v5022_v7 = vpop.eup %5021 }
 0x37d   :  { %v1019_v11 = vmul.f32 %v5022_v7, %v1014_v6 }
 0x37f   :  { %3550 = vmatmul.mubr.f32.vlgmr.msra.gmra.mrb[12].mxu0 %v1019_v11  ;;  %3585 = vmatmul.mubr.f32.vlgmr.msra.gmra.mrb[12].mxu1 %v1019_v11 }
 0x380   :  { %4555 = vmatpush3.bf16.msra.mxu0 %v5259_v54  ;;  %4579 = vmatpush3.bf16.msra.mxu1 %v5263_v57 }
 0x381   :  { %4556 = vmatprep.subr.bf16.mxu0 %v5149_v0  ;;  %4580 = vmatprep.subr.bf16.mxu1 %v5149_v0 }
 0x382   :  { %3619 = vmatprep.mubr.msk.f32.mxu0 %vm5150_vm0, %v5151_v1  ;;  %3654 = vmatprep.mubr.msk.f32.mxu1 %vm5150_vm0, %v5151_v1 }
 0x384   :  { %4558 = vmatpush3.bf16.msra.mxu0 %v5268_v60  ;;  %4582 = vmatpush3.bf16.msra.mxu1 %v5275_v63 }
 0x385   :  { %4559 = vmatprep.subr.bf16.mxu0 %v5149_v0  ;;  %4583 = vmatprep.subr.bf16.mxu1 %v5149_v0 }
 0x388   :  { %4561 = vmatpush3.bf16.msra.mxu0 %v5281_v4  ;;  %4585 = vmatpush3.bf16.msra.mxu1 %v5285_v8 }
 0x389   :  { %4562 = vmatprep.subr.bf16.mxu0 %v5149_v0  ;;  %4586 = vmatprep.subr.bf16.mxu1 %v5149_v0 }
 0x38c   :  { %4564 = vmatpush3.bf16.msra.mxu0 %v5289_v13  ;;  %4588 = vmatpush3.bf16.msra.mxu1 %v5293_v17 }
 0x38d   :  { %4565 = vmatprep.subr.bf16.mxu0 %v5149_v0  ;;  %4589 = vmatprep.subr.bf16.mxu1 %v5149_v0 }
 0x390   :  { %4567 = vmatpush3.bf16.msra.mxu0 %v5297_v22  ;;  %4591 = vmatpush3.bf16.msra.mxu1 %v5301_v26 }
 0x391   :  { %4568 = vmatprep.subr.bf16.mxu0 %v5149_v0  ;;  %4592 = vmatprep.subr.bf16.mxu1 %v5149_v0 }
 0x394   :  { %4570 = vmatpush3.bf16.msra.mxu0 %v5305_v31  ;;  %4594 = vmatpush3.bf16.msra.mxu1 %v5309_v35 }
 0x395   :  { %4571 = vmatprep.subr.bf16.mxu0 %v5149_v0  ;;  %4595 = vmatprep.subr.bf16.mxu1 %v5149_v0 }
 0x398   :  { %4573 = vmatpush3.bf16.msra.mxu0 %v5313_v40  ;;  %4597 = vmatpush3.bf16.msra.mxu1 %v5317_v44 }
 0x399   :  { %4574 = vmatprep.subr.bf16.mxu0 %v5149_v0  ;;  %4598 = vmatprep.subr.bf16.mxu1 %v5149_v0 }
 0x39c   :  { %4576 = vmatpush3.bf16.msra.mxu0 %v5321_v49  ;;  %4600 = vmatpush3.bf16.msra.mxu1 %v5325_v50 }
 0x39d   :  { %4601 = vmatprep.subr.bf16.mxu0 %v5149_v0  ;;  %4625 = vmatprep.subr.bf16.mxu1 %v5149_v0 }
 0x39f   :  { %3620 = vmatmul.mubr.f32.vlgmr.msra.gmra.mrb[14].mxu0 %v1019_v11  ;;  %3655 = vmatmul.mubr.f32.vlgmr.msra.gmra.mrb[14].mxu1 %v1019_v11 }
 0x3a0   :  { %4603 = vmatpush3.bf16.msra.mxu0 %v5198_v5  ;;  %4627 = vmatpush3.bf16.msra.mxu1 %v5203_v10 }
 0x3a1   :  { %4604 = vmatprep.subr.bf16.mxu0 %v5149_v0  ;;  %4628 = vmatprep.subr.bf16.mxu1 %v5149_v0 }
 0x3a2   :  { %3689 = vmatprep.mubr.msk.f32.mxu0 %vm5150_vm0, %v5151_v1  ;;  %3724 = vmatprep.mubr.msk.f32.mxu1 %vm5150_vm0, %v5151_v1 }
 0x3a4   :  { %4606 = vmatpush3.bf16.msra.mxu0 %v5201_v9  ;;  %4630 = vmatpush3.bf16.msra.mxu1 %v5207_v15 }
 0x3a5   :  { %4607 = vmatprep.subr.bf16.mxu0 %v5149_v0  ;;  %4631 = vmatprep.subr.bf16.mxu1 %v5149_v0 }
 0x3a8   :  { %4609 = vmatpush3.bf16.msra.mxu0 %v5211_v18  ;;  %4633 = vmatpush3.bf16.msra.mxu1 %v5215_v21 }
 0x3a9   :  { %4610 = vmatprep.subr.bf16.mxu0 %v5149_v0  ;;  %4634 = vmatprep.subr.bf16.mxu1 %v5149_v0 }
 0x3ac   :  { %4612 = vmatpush3.bf16.msra.mxu0 %v5219_v24  ;;  %4636 = vmatpush3.bf16.msra.mxu1 %v5223_v27 }
 0x3ad   :  { %4613 = vmatprep.subr.bf16.mxu0 %v5149_v0  ;;  %4637 = vmatprep.subr.bf16.mxu1 %v5149_v0 }
 0x3b0   :  { %4615 = vmatpush3.bf16.msra.mxu0 %v5227_v30  ;;  %4639 = vmatpush3.bf16.msra.mxu1 %v5231_v33 }
 0x3b1   :  { %4616 = vmatprep.subr.bf16.mxu0 %v5149_v0  ;;  %4640 = vmatprep.subr.bf16.mxu1 %v5149_v0 }
 0x3b4   :  { %4618 = vmatpush3.bf16.msra.mxu0 %v5235_v36  ;;  %4642 = vmatpush3.bf16.msra.mxu1 %v5239_v39 }
 0x3b5   :  { %4619 = vmatprep.subr.bf16.mxu0 %v5149_v0  ;;  %4643 = vmatprep.subr.bf16.mxu1 %v5149_v0 }
 0x3b8   :  { %4621 = vmatpush3.bf16.msra.mxu0 %v5243_v42  ;;  %4645 = vmatpush3.bf16.msra.mxu1 %v5247_v45 }
 0x3b9   :  { %4622 = vmatprep.subr.bf16.mxu0 %v5149_v0  ;;  %4646 = vmatprep.subr.bf16.mxu1 %v5149_v0 }
 0x3bc   :  { %4624 = vmatpush3.bf16.msra.mxu0 %v5251_v48  ;;  %4648 = vmatpush3.bf16.msra.mxu1 %v5255_v51 }
 0x3bd   :  { %4649 = vmatprep.subr.bf16.mxu0 %v5149_v0  ;;  %4673 = vmatprep.subr.bf16.mxu1 %v5149_v0 }
 0x452   :  { %v1091_v56 = vpop.f32.mrb[12].mxu0  ;;  %v1165_v12 = vpop.f32.mrb[12].mxu1 }
 0x453   :  { %v3551_v14 = vpop.f32.mrb[13].mxu0  ;;  %v3586_v16 = vpop.f32.mrb[13].mxu1  ;;  %v1166_v23 = vadd.f32 %v1165_v12, %v1022_v19  ;;  %v1092_v25 = vadd.f32 %v1091_v56, %v1021_v20 }
 0x455   :  { %v1169_v28 = vmul.f32 0.5, %v1166_v23  ;;  %v1095_v29 = vmul.f32 0.5, %v1092_v25 }
 0x457   :  { %5023 = vtanh.f32 %v1169_v28  ;;  %v1325_v28 = vld [vmem:[#allocation3 + $0x88] sm:$0xff] }
 0x458   :  { %5025 = vtanh.f32 %v1095_v29  ;;  %v1324_v29 = vld [vmem:[#allocation3 + $0x80] sm:$0xff] }
 0x461   :  { %v5024_v53 = vpop.eup %5023 }
 0x462   :  { %v5026_v55 = vpop.eup %5025  ;;  %v1171_v58 = vadd.f32 1.0, %v5024_v53 }
 0x463   :  { %v1097_v61 = vadd.f32 1.0, %v5026_v55 }
 0x464   :  { %v1172_v62 = vmul.f32 0.5, %v1171_v58 }
 0x465   :  { %v1098_v46 = vmul.f32 0.5, %v1097_v61 }
 0x466   :  { %v1318_v6 = vmul.f32 %v1172_v62, %v5522_v2 }
 0x472   :  { %v1239_v37 = vpop.f32.mrb[14].mxu0  ;;  %v1310_v38 = vpop.f32.mrb[14].mxu1 }
 0x473   :  { %v1240_v41 = vadd.f32 %v1239_v37, %v1023_v32  ;;  %v3621_v43 = vpop.f32.mrb[15].mxu0  ;;  %v3656_v47 = vpop.f32.mrb[15].mxu1  ;;  %v1311_v52 = vadd.f32 %v1310_v38, %v1024_v34 }
 0x474   :  { %v1327_v43 = vld [vmem:[#allocation3 + $0x98] sm:$0xff] }
 0x475   :  { %5027 = vtanh.f32 %v1240_v41  ;;  %v1314_v59 = vmul.f32 0.5, %v1311_v52  ;;  %v1326_v41 = vld [vmem:[#allocation3 + $0x90] sm:$0xff] }
 0x477   :  { %5029 = vtanh.f32 %v1314_v59 }
 0x47f   :  { %v5028_v3 = vpop.eup %5027 }
 0x480   :  { %v1319_v7 = vmul.f32 %v5028_v3, %v1098_v46 }
 0x481   :  { %v5030_v56 = vpop.eup %5029 }
 0x482   :  { %v5598_v11 = vadd.f32 %v1319_v7, %v1318_v6  ;;  %v1316_v12 = vadd.f32 1.0, %v5030_v56 }
 0x484   :  { %5031 = vtanh.f32 %v5598_v11  ;;  %v1317_v14 = vmul.f32 0.5, %v1316_v12 }
 0x48e   :  { %v5032_v16 = vpop.eup %5031 }
 0x48f   :  { %v1322_v19 = vmul.f32 %v5032_v16, %v1317_v14 }
 0x491   :  { %3690 = vmatmul.mubr.f32.vlgmr.msra.gmra.mrb[16].mxu0 %v1322_v19  ;;  %3725 = vmatmul.mubr.f32.vlgmr.msra.gmra.mrb[16].mxu1 %v1322_v19 }
 0x492   :  { %4651 = vmatpush3.bf16.msra.mxu0 %v5259_v54  ;;  %4675 = vmatpush3.bf16.msra.mxu1 %v5263_v57 }
 0x493   :  { %4652 = vmatprep.subr.bf16.mxu0 %v5149_v0  ;;  %4676 = vmatprep.subr.bf16.mxu1 %v5149_v0 }
 0x494   :  { %3759 = vmatprep.mubr.msk.f32.mxu0 %vm5150_vm0, %v5151_v1  ;;  %3794 = vmatprep.mubr.msk.f32.mxu1 %vm5150_vm0, %v5151_v1 }
 0x496   :  { %4654 = vmatpush3.bf16.msra.mxu0 %v5268_v60  ;;  %4678 = vmatpush3.bf16.msra.mxu1 %v5275_v63 }
 0x497   :  { %4655 = vmatprep.subr.bf16.mxu0 %v5149_v0  ;;  %4679 = vmatprep.subr.bf16.mxu1 %v5149_v0 }
 0x49a   :  { %4657 = vmatpush3.bf16.msra.mxu0 %v5281_v4  ;;  %4681 = vmatpush3.bf16.msra.mxu1 %v5285_v8 }
 0x49b   :  { %4658 = vmatprep.subr.bf16.mxu0 %v5149_v0  ;;  %4682 = vmatprep.subr.bf16.mxu1 %v5149_v0 }
 0x49e   :  { %4660 = vmatpush3.bf16.msra.mxu0 %v5289_v13  ;;  %4684 = vmatpush3.bf16.msra.mxu1 %v5293_v17 }
 0x49f   :  { %4661 = vmatprep.subr.bf16.mxu0 %v5149_v0  ;;  %4685 = vmatprep.subr.bf16.mxu1 %v5149_v0 }
 0x4a2   :  { %4663 = vmatpush3.bf16.msra.mxu0 %v5297_v22  ;;  %4687 = vmatpush3.bf16.msra.mxu1 %v5301_v26 }
 0x4a3   :  { %4664 = vmatprep.subr.bf16.mxu0 %v5149_v0  ;;  %4688 = vmatprep.subr.bf16.mxu1 %v5149_v0 }
 0x4a6   :  { %4666 = vmatpush3.bf16.msra.mxu0 %v5305_v31  ;;  %4690 = vmatpush3.bf16.msra.mxu1 %v5309_v35 }
 0x4a7   :  { %4667 = vmatprep.subr.bf16.mxu0 %v5149_v0  ;;  %4691 = vmatprep.subr.bf16.mxu1 %v5149_v0 }
 0x4aa   :  { %4669 = vmatpush3.bf16.msra.mxu0 %v5313_v40  ;;  %4693 = vmatpush3.bf16.msra.mxu1 %v5317_v44 }
 0x4ab   :  { %4670 = vmatprep.subr.bf16.mxu0 %v5149_v0  ;;  %4694 = vmatprep.subr.bf16.mxu1 %v5149_v0 }
 0x4ae   :  { %4672 = vmatpush3.bf16.msra.mxu0 %v5321_v49  ;;  %4696 = vmatpush3.bf16.msra.mxu1 %v5325_v50 }
 0x4af   :  { %4697 = vmatprep.subr.bf16.mxu0 %v5149_v0  ;;  %4721 = vmatprep.subr.bf16.mxu1 %v5149_v0 }
 0x4b1   :  { %3760 = vmatmul.mubr.f32.vlgmr.msra.gmra.mrb[18].mxu0 %v1322_v19  ;;  %3795 = vmatmul.mubr.f32.vlgmr.msra.gmra.mrb[18].mxu1 %v1322_v19 }
 0x4b2   :  { %4699 = vmatpush3.bf16.msra.mxu0 %v5198_v5  ;;  %4723 = vmatpush3.bf16.msra.mxu1 %v5203_v10 }
 0x4b3   :  { %4700 = vmatprep.subr.bf16.mxu0 %v5149_v0  ;;  %4724 = vmatprep.subr.bf16.mxu1 %v5149_v0 }
 0x4b4   :  { %3829 = vmatprep.mubr.msk.f32.mxu0 %vm5150_vm0, %v5151_v1  ;;  %3864 = vmatprep.mubr.msk.f32.mxu1 %vm5150_vm0, %v5151_v1 }
 0x4b6   :  { %4702 = vmatpush3.bf16.msra.mxu0 %v5201_v9  ;;  %4726 = vmatpush3.bf16.msra.mxu1 %v5207_v15 }
 0x4b7   :  { %4703 = vmatprep.subr.bf16.mxu0 %v5149_v0  ;;  %4727 = vmatprep.subr.bf16.mxu1 %v5149_v0 }
 0x4ba   :  { %4705 = vmatpush3.bf16.msra.mxu0 %v5211_v18  ;;  %4729 = vmatpush3.bf16.msra.mxu1 %v5215_v21 }
 0x4bb   :  { %4706 = vmatprep.subr.bf16.mxu0 %v5149_v0  ;;  %4730 = vmatprep.subr.bf16.mxu1 %v5149_v0 }
 0x4be   :  { %4708 = vmatpush3.bf16.msra.mxu0 %v5219_v24  ;;  %4732 = vmatpush3.bf16.msra.mxu1 %v5223_v27 }
 0x4bf   :  { %4709 = vmatprep.subr.bf16.mxu0 %v5149_v0  ;;  %4733 = vmatprep.subr.bf16.mxu1 %v5149_v0 }
 0x4c2   :  { %4711 = vmatpush3.bf16.msra.mxu0 %v5227_v30  ;;  %4735 = vmatpush3.bf16.msra.mxu1 %v5231_v33 }
 0x4c3   :  { %4712 = vmatprep.subr.bf16.mxu0 %v5149_v0  ;;  %4736 = vmatprep.subr.bf16.mxu1 %v5149_v0 }
 0x4c6   :  { %4714 = vmatpush3.bf16.msra.mxu0 %v5235_v36  ;;  %4738 = vmatpush3.bf16.msra.mxu1 %v5239_v39 }
 0x4c7   :  { %4715 = vmatprep.subr.bf16.mxu0 %v5149_v0  ;;  %4739 = vmatprep.subr.bf16.mxu1 %v5149_v0 }
 0x4ca   :  { %4717 = vmatpush3.bf16.msra.mxu0 %v5243_v42  ;;  %4741 = vmatpush3.bf16.msra.mxu1 %v5247_v45 }
 0x4cb   :  { %4718 = vmatprep.subr.bf16.mxu0 %v5149_v0  ;;  %4742 = vmatprep.subr.bf16.mxu1 %v5149_v0 }
 0x4ce   :  { %4720 = vmatpush3.bf16.msra.mxu0 %v5251_v48  ;;  %4744 = vmatpush3.bf16.msra.mxu1 %v5255_v51 }
 0x4cf   :  { %4745 = vmatprep.subr.bf16.mxu0 %v5149_v0  ;;  %4769 = vmatprep.subr.bf16.mxu1 %v5149_v0 }
 0x564   :  { %v1394_v2 = vpop.f32.mrb[16].mxu0  ;;  %v1468_v20 = vpop.f32.mrb[16].mxu1 }
 0x565   :  { %v3691_v23 = vpop.f32.mrb[17].mxu0  ;;  %v3726_v25 = vpop.f32.mrb[17].mxu1  ;;  %v1469_v32 = vadd.f32 %v1468_v20, %v1325_v28  ;;  %v1395_v34 = vadd.f32 %v1394_v2, %v1324_v29 }
 0x567   :  { %v1472_v37 = vmul.f32 0.5, %v1469_v32  ;;  %v1398_v38 = vmul.f32 0.5, %v1395_v34 }
 0x569   :  { %5033 = vtanh.f32 %v1472_v37  ;;  %v1628_v37 = vld [vmem:[#allocation3 + $0xa8] sm:$0xff] }
 0x56a   :  { %5035 = vtanh.f32 %v1398_v38  ;;  %v1627_v38 = vld [vmem:[#allocation3 + $0xa0] sm:$0xff] }
 0x573   :  { %v5034_v61 = vpop.eup %5033 }
 0x574   :  { %v5036_v62 = vpop.eup %5035  ;;  %v1474_v46 = vadd.f32 1.0, %v5034_v61 }
 0x575   :  { %v1400_v6 = vadd.f32 1.0, %v5036_v62 }
 0x576   :  { %v1475_v7 = vmul.f32 0.5, %v1474_v46 }
 0x577   :  { %v1401_v56 = vmul.f32 0.5, %v1400_v6 }
 0x578   :  { %v1621_v14 = vmul.f32 %v1475_v7, %v5598_v11 }
 0x584   :  { %v1542_v47 = vpop.f32.mrb[18].mxu0  ;;  %v1613_v52 = vpop.f32.mrb[18].mxu1 }
 0x585   :  { %v1543_v53 = vadd.f32 %v1542_v47, %v1326_v41  ;;  %v3761_v55 = vpop.f32.mrb[19].mxu0  ;;  %v3796_v58 = vpop.f32.mrb[19].mxu1  ;;  %v1614_v59 = vadd.f32 %v1613_v52, %v1327_v43 }
 0x586   :  { %v1630_v55 = vld [vmem:[#allocation3 + $0xb8] sm:$0xff] }
 0x587   :  { %5037 = vtanh.f32 %v1543_v53  ;;  %v1617_v3 = vmul.f32 0.5, %v1614_v59  ;;  %v1629_v53 = vld [vmem:[#allocation3 + $0xb0] sm:$0xff] }
 0x589   :  { %5039 = vtanh.f32 %v1617_v3 }
 0x591   :  { %v5038_v12 = vpop.eup %5037 }
 0x592   :  { %v1622_v16 = vmul.f32 %v5038_v12, %v1401_v56 }
 0x593   :  { %v5040_v2 = vpop.eup %5039 }
 0x594   :  { %v5674_v19 = vadd.f32 %v1622_v16, %v1621_v14  ;;  %v1619_v20 = vadd.f32 1.0, %v5040_v2 }
 0x596   :  { %5041 = vtanh.f32 %v5674_v19  ;;  %v1620_v23 = vmul.f32 0.5, %v1619_v20 }
 0x5a0   :  { %v5042_v25 = vpop.eup %5041 }
 0x5a1   :  { %v1625_v28 = vmul.f32 %v5042_v25, %v1620_v23 }
 0x5a3   :  { %3830 = vmatmul.mubr.f32.vlgmr.msra.gmra.mrb[20].mxu0 %v1625_v28  ;;  %3865 = vmatmul.mubr.f32.vlgmr.msra.gmra.mrb[20].mxu1 %v1625_v28 }
 0x5a4   :  { %4747 = vmatpush3.bf16.msra.mxu0 %v5259_v54  ;;  %4771 = vmatpush3.bf16.msra.mxu1 %v5263_v57 }
 0x5a5   :  { %4748 = vmatprep.subr.bf16.mxu0 %v5149_v0  ;;  %4772 = vmatprep.subr.bf16.mxu1 %v5149_v0 }
 0x5a6   :  { %3899 = vmatprep.mubr.msk.f32.mxu0 %vm5150_vm0, %v5151_v1  ;;  %3934 = vmatprep.mubr.msk.f32.mxu1 %vm5150_vm0, %v5151_v1 }
 0x5a8   :  { %4750 = vmatpush3.bf16.msra.mxu0 %v5268_v60  ;;  %4774 = vmatpush3.bf16.msra.mxu1 %v5275_v63 }
 0x5a9   :  { %4751 = vmatprep.subr.bf16.mxu0 %v5149_v0  ;;  %4775 = vmatprep.subr.bf16.mxu1 %v5149_v0 }
 0x5ac   :  { %4753 = vmatpush3.bf16.msra.mxu0 %v5281_v4  ;;  %4777 = vmatpush3.bf16.msra.mxu1 %v5285_v8 }
 0x5ad   :  { %4754 = vmatprep.subr.bf16.mxu0 %v5149_v0  ;;  %4778 = vmatprep.subr.bf16.mxu1 %v5149_v0 }
 0x5b0   :  { %4756 = vmatpush3.bf16.msra.mxu0 %v5289_v13  ;;  %4780 = vmatpush3.bf16.msra.mxu1 %v5293_v17 }
 0x5b1   :  { %4757 = vmatprep.subr.bf16.mxu0 %v5149_v0  ;;  %4781 = vmatprep.subr.bf16.mxu1 %v5149_v0 }
 0x5b4   :  { %4759 = vmatpush3.bf16.msra.mxu0 %v5297_v22  ;;  %4783 = vmatpush3.bf16.msra.mxu1 %v5301_v26 }
 0x5b5   :  { %4760 = vmatprep.subr.bf16.mxu0 %v5149_v0  ;;  %4784 = vmatprep.subr.bf16.mxu1 %v5149_v0 }
 0x5b8   :  { %4762 = vmatpush3.bf16.msra.mxu0 %v5305_v31  ;;  %4786 = vmatpush3.bf16.msra.mxu1 %v5309_v35 }
 0x5b9   :  { %4763 = vmatprep.subr.bf16.mxu0 %v5149_v0  ;;  %4787 = vmatprep.subr.bf16.mxu1 %v5149_v0 }
 0x5bc   :  { %4765 = vmatpush3.bf16.msra.mxu0 %v5313_v40  ;;  %4789 = vmatpush3.bf16.msra.mxu1 %v5317_v44 }
 0x5bd   :  { %4766 = vmatprep.subr.bf16.mxu0 %v5149_v0  ;;  %4790 = vmatprep.subr.bf16.mxu1 %v5149_v0 }
 0x5c0   :  { %4768 = vmatpush3.bf16.msra.mxu0 %v5321_v49  ;;  %4792 = vmatpush3.bf16.msra.mxu1 %v5325_v50 }
 0x5c1   :  { %4793 = vmatprep.subr.bf16.mxu0 %v5149_v0  ;;  %4817 = vmatprep.subr.bf16.mxu1 %v5149_v0 }
 0x5c3   :  { %3900 = vmatmul.mubr.f32.vlgmr.msra.gmra.mrb[22].mxu0 %v1625_v28  ;;  %3935 = vmatmul.mubr.f32.vlgmr.msra.gmra.mrb[22].mxu1 %v1625_v28 }
 0x5c4   :  { %4795 = vmatpush3.bf16.msra.mxu0 %v5198_v5  ;;  %4819 = vmatpush3.bf16.msra.mxu1 %v5203_v10 }
 0x5c5   :  { %4796 = vmatprep.subr.bf16.mxu0 %v5149_v0  ;;  %4820 = vmatprep.subr.bf16.mxu1 %v5149_v0 }
 0x5c6   :  { %3969 = vmatprep.mubr.msk.f32.mxu0 %vm5150_vm0, %v5151_v1  ;;  %4004 = vmatprep.mubr.msk.f32.mxu1 %vm5150_vm0, %v5151_v1 }
 0x5c8   :  { %4798 = vmatpush3.bf16.msra.mxu0 %v5201_v9  ;;  %4822 = vmatpush3.bf16.msra.mxu1 %v5207_v15 }
 0x5c9   :  { %4799 = vmatprep.subr.bf16.mxu0 %v5149_v0  ;;  %4823 = vmatprep.subr.bf16.mxu1 %v5149_v0 }
 0x5cc   :  { %4801 = vmatpush3.bf16.msra.mxu0 %v5211_v18  ;;  %4825 = vmatpush3.bf16.msra.mxu1 %v5215_v21 }
 0x5cd   :  { %4802 = vmatprep.subr.bf16.mxu0 %v5149_v0  ;;  %4826 = vmatprep.subr.bf16.mxu1 %v5149_v0 }
 0x5d0   :  { %4804 = vmatpush3.bf16.msra.mxu0 %v5219_v24  ;;  %4828 = vmatpush3.bf16.msra.mxu1 %v5223_v27 }
 0x5d1   :  { %4805 = vmatprep.subr.bf16.mxu0 %v5149_v0  ;;  %4829 = vmatprep.subr.bf16.mxu1 %v5149_v0 }
 0x5d4   :  { %4807 = vmatpush3.bf16.msra.mxu0 %v5227_v30  ;;  %4831 = vmatpush3.bf16.msra.mxu1 %v5231_v33 }
 0x5d5   :  { %4808 = vmatprep.subr.bf16.mxu0 %v5149_v0  ;;  %4832 = vmatprep.subr.bf16.mxu1 %v5149_v0 }
 0x5d8   :  { %4810 = vmatpush3.bf16.msra.mxu0 %v5235_v36  ;;  %4834 = vmatpush3.bf16.msra.mxu1 %v5239_v39 }
 0x5d9   :  { %4811 = vmatprep.subr.bf16.mxu0 %v5149_v0  ;;  %4835 = vmatprep.subr.bf16.mxu1 %v5149_v0 }
 0x5dc   :  { %4813 = vmatpush3.bf16.msra.mxu0 %v5243_v42  ;;  %4837 = vmatpush3.bf16.msra.mxu1 %v5247_v45 }
 0x5dd   :  { %4814 = vmatprep.subr.bf16.mxu0 %v5149_v0  ;;  %4838 = vmatprep.subr.bf16.mxu1 %v5149_v0 }
 0x5e0   :  { %4816 = vmatpush3.bf16.msra.mxu0 %v5251_v48  ;;  %4840 = vmatpush3.bf16.msra.mxu1 %v5255_v51 }
 0x5e1   :  { %4841 = vmatprep.subr.bf16.mxu0 %v5149_v0  ;;  %4865 = vmatprep.subr.bf16.mxu1 %v5149_v0 }
 0x676   :  { %v1697_v11 = vpop.f32.mrb[20].mxu0  ;;  %v1771_v29 = vpop.f32.mrb[20].mxu1 }
 0x677   :  { %v3831_v32 = vpop.f32.mrb[21].mxu0  ;;  %v3866_v34 = vpop.f32.mrb[21].mxu1  ;;  %v1772_v41 = vadd.f32 %v1771_v29, %v1628_v37  ;;  %v1698_v43 = vadd.f32 %v1697_v11, %v1627_v38 }
 0x679   :  { %v1775_v47 = vmul.f32 0.5, %v1772_v41  ;;  %v1701_v52 = vmul.f32 0.5, %v1698_v43 }
 0x67b   :  { %5043 = vtanh.f32 %v1775_v47 }
 0x67c   :  { %5045 = vtanh.f32 %v1701_v52 }
 0x685   :  { %v5044_v6 = vpop.eup %5043 }
 0x686   :  { %v5046_v7 = vpop.eup %5045  ;;  %v1777_v56 = vadd.f32 1.0, %v5044_v6 }
 0x687   :  { %v1703_v14 = vadd.f32 1.0, %v5046_v7 }
 0x688   :  { %v1778_v16 = vmul.f32 0.5, %v1777_v56 }
 0x689   :  { %v1704_v2 = vmul.f32 0.5, %v1703_v14 }
 0x68a   :  { %v1924_v23 = vmul.f32 %v1778_v16, %v5674_v19 }
 0x696   :  { %v1845_v58 = vpop.f32.mrb[22].mxu0  ;;  %v1916_v59 = vpop.f32.mrb[22].mxu1 }
 0x697   :  { %v1846_v61 = vadd.f32 %v1845_v58, %v1629_v53  ;;  %v3901_v62 = vpop.f32.mrb[23].mxu0  ;;  %v3936_v46 = vpop.f32.mrb[23].mxu1  ;;  %v1917_v3 = vadd.f32 %v1916_v59, %v1630_v55 }
 0x699   :  { %5047 = vtanh.f32 %v1846_v61  ;;  %v1920_v12 = vmul.f32 0.5, %v1917_v3 }
 0x69b   :  { %5049 = vtanh.f32 %v1920_v12 }
 0x6a3   :  { %v5048_v20 = vpop.eup %5047 }
 0x6a4   :  { %v1925_v25 = vmul.f32 %v5048_v20, %v1704_v2 }
 0x6a5   :  { %v5050_v11 = vpop.eup %5049 }
 0x6a6   :  { %v5750_v28 = vadd.f32 %v1925_v25, %v1924_v23  ;;  %v1922_v29 = vadd.f32 1.0, %v5050_v11 }
 0x6a8   :  { %5051 = vtanh.f32 %v5750_v28  ;;  %v1923_v32 = vmul.f32 0.5, %v1922_v29 }
 0x6b2   :  { %v5052_v34 = vpop.eup %5051 }
 0x6b3   :  { %v1928_v37 = vmul.f32 %v5052_v34, %v1923_v32 }
 0x6b5   :  { %3970 = vmatmul.mubr.f32.vlgmr.msra.gmra.mrb[24].mxu0 %v1928_v37  ;;  %4005 = vmatmul.mubr.f32.vlgmr.msra.gmra.mrb[24].mxu1 %v1928_v37 }
 0x6b6   :  { %4843 = vmatpush3.bf16.msra.mxu0 %v5259_v54  ;;  %4867 = vmatpush3.bf16.msra.mxu1 %v5263_v57 }
 0x6b7   :  { %4844 = vmatprep.subr.bf16.mxu0 %v5149_v0  ;;  %4868 = vmatprep.subr.bf16.mxu1 %v5149_v0 }
 0x6b8   :  { %4039 = vmatprep.mubr.msk.f32.mxu0 %vm5150_vm0, %v5151_v1  ;;  %4074 = vmatprep.mubr.msk.f32.mxu1 %vm5150_vm0, %v5151_v1 }
 0x6ba   :  { %4846 = vmatpush3.bf16.msra.mxu0 %v5268_v60  ;;  %4870 = vmatpush3.bf16.msra.mxu1 %v5275_v63 }
 0x6bb   :  { %4847 = vmatprep.subr.bf16.mxu0 %v5149_v0  ;;  %4871 = vmatprep.subr.bf16.mxu1 %v5149_v0 }
 0x6be   :  { %4849 = vmatpush3.bf16.msra.mxu0 %v5281_v4  ;;  %4873 = vmatpush3.bf16.msra.mxu1 %v5285_v8 }
 0x6bf   :  { %4850 = vmatprep.subr.bf16.mxu0 %v5149_v0  ;;  %4874 = vmatprep.subr.bf16.mxu1 %v5149_v0 }
 0x6c2   :  { %4852 = vmatpush3.bf16.msra.mxu0 %v5289_v13  ;;  %4876 = vmatpush3.bf16.msra.mxu1 %v5293_v17 }
 0x6c3   :  { %4853 = vmatprep.subr.bf16.mxu0 %v5149_v0  ;;  %4877 = vmatprep.subr.bf16.mxu1 %v5149_v0 }
 0x6c6   :  { %4855 = vmatpush3.bf16.msra.mxu0 %v5297_v22  ;;  %4879 = vmatpush3.bf16.msra.mxu1 %v5301_v26 }
 0x6c7   :  { %4856 = vmatprep.subr.bf16.mxu0 %v5149_v0  ;;  %4880 = vmatprep.subr.bf16.mxu1 %v5149_v0 }
 0x6ca   :  { %4858 = vmatpush3.bf16.msra.mxu0 %v5305_v31  ;;  %4882 = vmatpush3.bf16.msra.mxu1 %v5309_v35 }
 0x6cb   :  { %4859 = vmatprep.subr.bf16.mxu0 %v5149_v0  ;;  %4883 = vmatprep.subr.bf16.mxu1 %v5149_v0 }
 0x6ce   :  { %4861 = vmatpush3.bf16.msra.mxu0 %v5313_v40  ;;  %4885 = vmatpush3.bf16.msra.mxu1 %v5317_v44 }
 0x6cf   :  { %4862 = vmatprep.subr.bf16.mxu0 %v5149_v0  ;;  %4886 = vmatprep.subr.bf16.mxu1 %v5149_v0 }
 0x6d2   :  { %4864 = vmatpush3.bf16.msra.mxu0 %v5321_v49  ;;  %4888 = vmatpush3.bf16.msra.mxu1 %v5325_v50 }
 0x6d3   :  { %4889 = vmatprep.subr.bf16.mxu0 %v5149_v0  ;;  %4913 = vmatprep.subr.bf16.mxu1 %v5149_v0 }
 0x6d5   :  { %4040 = vmatmul.mubr.f32.vlgmr.msra.gmra.mrb[26].mxu0 %v1928_v37  ;;  %4075 = vmatmul.mubr.f32.vlgmr.msra.gmra.mrb[26].mxu1 %v1928_v37 }
 0x6d6   :  { %4891 = vmatpush3.bf16.msra.mxu0 %v5198_v5  ;;  %4915 = vmatpush3.bf16.msra.mxu1 %v5203_v10 }
 0x6d7   :  { %4892 = vmatprep.subr.bf16.mxu0 %v5149_v0  ;;  %4916 = vmatprep.subr.bf16.mxu1 %v5149_v0 }
 0x6d8   :  { %4109 = vmatprep.mubr.msk.f32.mxu0 %vm5150_vm0, %v5151_v1  ;;  %4144 = vmatprep.mubr.msk.f32.mxu1 %vm5150_vm0, %v5151_v1 }
 0x6da   :  { %4894 = vmatpush3.bf16.msra.mxu0 %v5201_v9  ;;  %4918 = vmatpush3.bf16.msra.mxu1 %v5207_v15 }
 0x6db   :  { %4895 = vmatprep.subr.bf16.mxu0 %v5149_v0  ;;  %4919 = vmatprep.subr.bf16.mxu1 %v5149_v0 }
 0x6de   :  { %4897 = vmatpush3.bf16.msra.mxu0 %v5211_v18  ;;  %4921 = vmatpush3.bf16.msra.mxu1 %v5215_v21  ;;  %v1931_v18 = vld [vmem:[#allocation3 + $0xc8] sm:$0xff]  ;;  %v1930_v21 = vld [vmem:[#allocation3 + $0xc0] sm:$0xff] }
 0x6df   :  { %4898 = vmatprep.subr.bf16.mxu0 %v5149_v0  ;;  %4922 = vmatprep.subr.bf16.mxu1 %v5149_v0 }
 0x6e2   :  { %4900 = vmatpush3.bf16.msra.mxu0 %v5219_v24  ;;  %4924 = vmatpush3.bf16.msra.mxu1 %v5223_v27 }
 0x6e3   :  { %4901 = vmatprep.subr.bf16.mxu0 %v5149_v0  ;;  %4925 = vmatprep.subr.bf16.mxu1 %v5149_v0 }
 0x6e6   :  { %4903 = vmatpush3.bf16.msra.mxu0 %v5227_v30  ;;  %4927 = vmatpush3.bf16.msra.mxu1 %v5231_v33 }
 0x6e7   :  { %4904 = vmatprep.subr.bf16.mxu0 %v5149_v0  ;;  %4928 = vmatprep.subr.bf16.mxu1 %v5149_v0 }
 0x6ea   :  { %4906 = vmatpush3.bf16.msra.mxu0 %v5235_v36  ;;  %4930 = vmatpush3.bf16.msra.mxu1 %v5239_v39  ;;  %v1932_v36 = vld [vmem:[#allocation3 + $0xd0] sm:$0xff]  ;;  %v1933_v39 = vld [vmem:[#allocation3 + $0xd8] sm:$0xff] }
 0x6eb   :  { %4907 = vmatprep.subr.bf16.mxu0 %v5149_v0  ;;  %4931 = vmatprep.subr.bf16.mxu1 %v5149_v0 }
 0x6ee   :  { %4909 = vmatpush3.bf16.msra.mxu0 %v5243_v42  ;;  %4933 = vmatpush3.bf16.msra.mxu1 %v5247_v45 }
 0x6ef   :  { %4910 = vmatprep.subr.bf16.mxu0 %v5149_v0  ;;  %4934 = vmatprep.subr.bf16.mxu1 %v5149_v0 }
 0x6f2   :  { %4912 = vmatpush3.bf16.msra.mxu0 %v5251_v48  ;;  %4936 = vmatpush3.bf16.msra.mxu1 %v5255_v51 }
 0x6f3   :  { %4937 = vmatprep.subr.bf16.mxu0 %v5149_v0  ;;  %4961 = vmatprep.subr.bf16.mxu1 %v5149_v0 }
 0x788   :  { %v2000_v5 = vpop.f32.mrb[24].mxu0  ;;  %v2074_v9 = vpop.f32.mrb[24].mxu1 }
 0x789   :  { %v3971_v10 = vpop.f32.mrb[25].mxu0  ;;  %v4006_v15 = vpop.f32.mrb[25].mxu1  ;;  %v2075_v24 = vadd.f32 %v2074_v9, %v1931_v18  ;;  %v2001_v27 = vadd.f32 %v2000_v5, %v1930_v21 }
 0x78b   :  { %v2078_v30 = vmul.f32 0.5, %v2075_v24  ;;  %v2004_v33 = vmul.f32 0.5, %v2001_v27 }
 0x78d   :  { %5053 = vtanh.f32 %v2078_v30 }
 0x78e   :  { %5055 = vtanh.f32 %v2004_v33 }
 0x797   :  { %v5054_v41 = vpop.eup %5053 }
 0x798   :  { %v5056_v43 = vpop.eup %5055  ;;  %v2080_v47 = vadd.f32 1.0, %v5054_v41 }
 0x799   :  { %v2006_v53 = vadd.f32 1.0, %v5056_v43 }
 0x79a   :  { %v2081_v55 = vmul.f32 0.5, %v2080_v47 }
 0x79b   :  { %v2007_v58 = vmul.f32 0.5, %v2006_v53 }
 0x79c   :  { %v2227_v61 = vmul.f32 %v2081_v55, %v5750_v28 }
 0x7a8   :  { %v2148_v42 = vpop.f32.mrb[26].mxu0  ;;  %v2219_v45 = vpop.f32.mrb[26].mxu1 }
 0x7a9   :  { %v2149_v48 = vadd.f32 %v2148_v42, %v1932_v36  ;;  %v4041_v51 = vpop.f32.mrb[27].mxu0  ;;  %v4076_v19 = vpop.f32.mrb[27].mxu1  ;;  %v2220_v38 = vadd.f32 %v2219_v45, %v1933_v39 }
 0x7ab   :  { %5057 = vtanh.f32 %v2149_v48  ;;  %v2223_v52 = vmul.f32 0.5, %v2220_v38 }
 0x7ad   :  { %5059 = vtanh.f32 %v2223_v52 }
 0x7b5   :  { %v5058_v59 = vpop.eup %5057 }
 0x7b6   :  { %v2228_v62 = vmul.f32 %v5058_v59, %v2007_v58 }
 0x7b7   :  { %v5060_v3 = vpop.eup %5059 }
 0x7b8   :  { %v5826_v46 = vadd.f32 %v2228_v62, %v2227_v61  ;;  %v2225_v6 = vadd.f32 1.0, %v5060_v3 }
 0x7ba   :  { %5061 = vtanh.f32 %v5826_v46  ;;  %v2226_v7 = vmul.f32 0.5, %v2225_v6 }
 0x7c4   :  { %v5062_v56 = vpop.eup %5061 }
 0x7c5   :  { %v2231_v12 = vmul.f32 %v5062_v56, %v2226_v7 }
 0x7c7   :  { %4110 = vmatmul.mubr.f32.vlgmr.msra.gmra.mrb[28].mxu0 %v2231_v12  ;;  %4145 = vmatmul.mubr.f32.vlgmr.msra.gmra.mrb[28].mxu1 %v2231_v12 }
 0x7c8   :  { %4939 = vmatpush3.bf16.msra.mxu0 %v5259_v54  ;;  %4963 = vmatpush3.bf16.msra.mxu1 %v5263_v57 }
 0x7c9   :  { %4940 = vmatprep.subr.bf16.mxu0 %v5149_v0  ;;  %4964 = vmatprep.subr.bf16.mxu1 %v5149_v0 }
 0x7ca   :  { %4179 = vmatprep.mubr.msk.f32.mxu0 %vm5150_vm0, %v5151_v1  ;;  %4214 = vmatprep.mubr.msk.f32.mxu1 %vm5150_vm0, %v5151_v1 }
 0x7cc   :  { %4942 = vmatpush3.bf16.msra.mxu0 %v5268_v60  ;;  %4966 = vmatpush3.bf16.msra.mxu1 %v5275_v63  ;;  %v2234_v63 = vld [vmem:[#allocation3 + $0xe8] sm:$0xff] }
 0x7cd   :  { %4943 = vmatprep.subr.bf16.mxu0 %v5149_v0  ;;  %4967 = vmatprep.subr.bf16.mxu1 %v5149_v0 }
 0x7d0   :  { %4945 = vmatpush3.bf16.msra.mxu0 %v5281_v4  ;;  %4969 = vmatpush3.bf16.msra.mxu1 %v5285_v8  ;;  %v2233_v4 = vld [vmem:[#allocation3 + $0xe0] sm:$0xff] }
 0x7d1   :  { %4946 = vmatprep.subr.bf16.mxu0 %v5149_v0  ;;  %4970 = vmatprep.subr.bf16.mxu1 %v5149_v0 }
 0x7d4   :  { %4948 = vmatpush3.bf16.msra.mxu0 %v5289_v13  ;;  %4972 = vmatpush3.bf16.msra.mxu1 %v5293_v17 }
 0x7d5   :  { %4949 = vmatprep.subr.bf16.mxu0 %v5149_v0  ;;  %4973 = vmatprep.subr.bf16.mxu1 %v5149_v0 }
 0x7d8   :  { %4951 = vmatpush3.bf16.msra.mxu0 %v5297_v22  ;;  %4975 = vmatpush3.bf16.msra.mxu1 %v5301_v26  ;;  %v2235_v26 = vld [vmem:[#allocation3 + $0xf0] sm:$0xff] }
 0x7d9   :  { %4952 = vmatprep.subr.bf16.mxu0 %v5149_v0  ;;  %4976 = vmatprep.subr.bf16.mxu1 %v5149_v0 }
 0x7dc   :  { %4954 = vmatpush3.bf16.msra.mxu0 %v5305_v31  ;;  %4978 = vmatpush3.bf16.msra.mxu1 %v5309_v35 }
 0x7dd   :  { %4955 = vmatprep.subr.bf16.mxu0 %v5149_v0  ;;  %4979 = vmatprep.subr.bf16.mxu1 %v5149_v0 }
 0x7e0   :  { %4957 = vmatpush3.bf16.msra.mxu0 %v5313_v40  ;;  %4981 = vmatpush3.bf16.msra.mxu1 %v5317_v44 }
 0x7e1   :  { %4958 = vmatprep.subr.bf16.mxu0 %v5149_v0  ;;  %4982 = vmatprep.subr.bf16.mxu1 %v5149_v0  ;;  %v2236_v0 = vld [vmem:[#allocation3 + $0xf8] sm:$0xff] }
 0x7e4   :  { %4960 = vmatpush3.bf16.msra.mxu0 %v5321_v49  ;;  %4984 = vmatpush3.bf16.msra.mxu1 %v5325_v50 }
 0x7e7   :  { %4180 = vmatmul.mubr.f32.vlgmr.msra.gmra.mrb[30].mxu0 %v2231_v12  ;;  %4215 = vmatmul.mubr.f32.vlgmr.msra.gmra.mrb[30].mxu1 %v2231_v12 }
 0x89a   :  { %v2303_v1 = vpop.f32.mrb[28].mxu0  ;;  %v2377_v54 = vpop.f32.mrb[28].mxu1 }
 0x89b   :  { %v4111_v57 = vpop.f32.mrb[29].mxu0  ;;  %v4146_v60 = vpop.f32.mrb[29].mxu1  ;;  %v2378_v8 = vadd.f32 %v2377_v54, %v2234_v63  ;;  %v2304_v13 = vadd.f32 %v2303_v1, %v2233_v4 }
 0x89d   :  { %v2381_v17 = vmul.f32 0.5, %v2378_v8  ;;  %v2307_v22 = vmul.f32 0.5, %v2304_v13 }
 0x89f   :  { %5063 = vtanh.f32 %v2381_v17 }
 0x8a0   :  { %5065 = vtanh.f32 %v2307_v22 }
 0x8a9   :  { %v5064_v14 = vpop.eup %5063 }
 0x8aa   :  { %v5066_v16 = vpop.eup %5065  ;;  %v2383_v2 = vadd.f32 1.0, %v5064_v14 }
 0x8ab   :  { %v2309_v23 = vadd.f32 1.0, %v5066_v16 }
 0x8ac   :  { %v2384_v25 = vmul.f32 0.5, %v2383_v2 }
 0x8ad   :  { %v2310_v28 = vmul.f32 0.5, %v2309_v23 }
 0x8ae   :  { %v2530_v29 = vmul.f32 %v2384_v25, %v5826_v46 }
 0x8ba   :  { %v2451_v31 = vpop.f32.mrb[30].mxu0  ;;  %v2522_v35 = vpop.f32.mrb[30].mxu1 }
 0x8bb   :  { %v2452_v40 = vadd.f32 %v2451_v31, %v2235_v26  ;;  %v4181_v44 = vpop.f32.mrb[31].mxu0  ;;  %v4216_v49 = vpop.f32.mrb[31].mxu1  ;;  %v2523_v50 = vadd.f32 %v2522_v35, %v2236_v0 }
 0x8bd   :  { %5067 = vtanh.f32 %v2452_v40  ;;  %v2526_v20 = vmul.f32 0.5, %v2523_v50 }
 0x8bf   :  { %5069 = vtanh.f32 %v2526_v20 }
 0x8c7   :  { %v5068_v11 = vpop.eup %5067 }
 0x8c8   :  { %v2531_v32 = vmul.f32 %v5068_v11, %v2310_v28 }
 0x8c9   :  { %v5070_v37 = vpop.eup %5069 }
 0x8ca   :  { %v2532_v34 = vadd.f32 %v2531_v32, %v2530_v29  ;;  %v2528_v5 = vadd.f32 1.0, %v5070_v37 }
 0x8cc   :  { %5071 = vtanh.f32 %v2532_v34  ;;  %v2529_v9 = vmul.f32 0.5, %v2528_v5 }
 0x8d6   :  { %v5072_v10 = vpop.eup %5071 }
 0x8d7   :  { %v2534_v15 = vmul.f32 %v5072_v10, %v2529_v9 }
 0x8d9   :  { %2535 = vst [vmem:[#allocation8] sm:$0xff] %v2534_v15 }
 0x8da   :  { %5128 = shalt.err (!%p5125_p6)
}
 0x8db   :  { %s5129_s10 = scalar_lea.hbm %s5878_s2, 128 }
 0x8dc   :  { %p5130_p7 = scmp.ne.s32.totalorder %s5878_s2, %s5129_s10  ;;  %p5133_p8 = scmp.lt.u32.totalorder %s5129_s10, %s5878_s2 }
 0x8de   :  { %p5135_p9 = pnand %p5133_p8, %p5130_p7 }
 0x8e0   :  { %5138 = shalt.err (!%p5135_p9)
}
 0x8e1   :  { %2546 = dma.vmem_to_hbm [thread:$0]  %s2544_s6, 128, %s5878_s2, [#allocation5]  }
 0x8e2   :  { %5143 = dma.done.wait [#allocation5], 128  }
 0x8e3   :  { %5144 = vsyncadd [#allocation5], 4294967168 }
 0x8e4   :  { %2550 = vsyncpa [#allocation4], 1 }
 0x8e5   :  { %2551 = vsyncpa [#allocation7], 1 }
 0x8e6   :  { %2552 = vsyncpa [#allocation5], 1 }

</bundles_post_ra>
